<compile_context>
chip_gen: v5e
topology: v5e:2x2
jax: 0.10.0
libtpu: 0.0.40
codegen_flags: <defaults>
</compile_context>

<pallas_src>
import numpy as np
import jax
import jax.numpy as jnp
from jax import lax
from jax.experimental import pallas as pl
from jax.experimental.pallas import tpu as pltpu

# ---------------- small test configuration (matches the module's constraints) ----
B = 2
EMBED_DIM = 32                 # Dm (== v_dim, required for the dwc residual add)
Q_DIM = 32                     # Dq
V_DIM = 32                     # Dv
NUM_HEADS = 4
H = W = 8
INTERNAL_RES = (H, W)          # AvgPool2d kernel == full spatial size
KERNEL_SIZE = 1
N = H * W                      # 64
BN = B * N                     # 128 (lane axis inside the kernel)
DQH = Q_DIM // NUM_HEADS
DVH = V_DIM // NUM_HEADS
ABS_MAX = 32.0 / KERNEL_SIZE ** 2
EPS = 1e-5
PHI_EPS = 1e-30                # guards 0 * inf -> NaN when relu(Q/K) is identically zero

# ---------------- packed parameter slab layout: (SLAB_ROWS, BN) = (136, 128) f32 ----
COL_WCAT  = 0                  # rows 0:4C , cols 0:Dm       : q/k/v/bias-net conv weights (stacked)
COL_HMASK = 32                 # rows 0:Dv , cols 32:32+B*Dq : block-diag head mask, tiled per batch
COL_LNW   = 96                 # rows 0:Dv                   : bias_norm LayerNorm weight
COL_LNB   = 97                 # rows 0:Dv                   : bias_norm LayerNorm bias
COL_BHU   = 98                 # rows 0:Dm                   : head-unification conv bias
COL_DWCW  = 99                 # rows 0:Dv                   : depthwise 1x1 conv weight (tiled per head)
COL_DWCB  = 100                # rows 0:Dv                   : depthwise 1x1 conv bias   (tiled per head)
COL_MASKT = 104                # rows 0:B*N, cols 104:104+B  : per-batch indicator columns
COL_BCAT  = 127                # rows 0:4C                   : q/k/v/bias-net conv biases (stacked)
ROW_WHU   = V_DIM              # rows 32:64, cols 32:64      : head-unification conv weight
COL_WHU   = 32
ROW_WCOL  = 4 * Q_DIM          # row 128                     : bilinear pool-to-1x1 weights (tiled over B)
ROW_MROWS = ROW_WCOL + 1       # rows 129:129+B              : per-batch indicator rows
SLAB_ROWS = ROW_MROWS + B + (8 - (ROW_MROWS + B) % 8) % 8    # -> 136 (multiple of 8)


# ---------------- bilinear resize-to-(1,1) weights (F.interpolate, align_corners=False) ----
def _bilinear_to_one_weights(n):
    src = n / 2.0 - 0.5
    i0 = int(np.floor(src))
    frac = src - i0
    w = np.zeros((n,), np.float32)
    i0c = min(max(i0, 0), n - 1)
    i1c = min(max(i0 + 1, 0), n - 1)
    w[i0c] += 1.0 - frac
    w[i1c] += frac
    return w


# ---------------- the single fused kernel ----------------
def fc_attn_kernel(x_ref, slab_ref, o_ref):
    # ---- static slices of the packed parameter slab (zero extra DMAs) ----
    w_cat  = slab_ref[0:4 * Q_DIM, COL_WCAT:COL_WCAT + EMBED_DIM]            # (4C, Dm)
    b_cat  = slab_ref[0:4 * Q_DIM, COL_BCAT:COL_BCAT + 1]                    # (4C, 1)
    mask_t = slab_ref[0:BN, COL_MASKT:COL_MASKT + B]                         # (B*N, B)
    hmask  = slab_ref[0:V_DIM, COL_HMASK:COL_HMASK + B * Q_DIM]              # (Dv, B*Dq)
    ln_w   = slab_ref[0:V_DIM, COL_LNW:COL_LNW + 1]                          # (Dv, 1)
    ln_b   = slab_ref[0:V_DIM, COL_LNB:COL_LNB + 1]
    b_hu   = slab_ref[0:EMBED_DIM, COL_BHU:COL_BHU + 1]
    dwc_w  = slab_ref[0:V_DIM, COL_DWCW:COL_DWCW + 1]
    dwc_b  = slab_ref[0:V_DIM, COL_DWCB:COL_DWCB + 1]
    w_hu   = slab_ref[ROW_WHU:ROW_WHU + EMBED_DIM, COL_WHU:COL_WHU + V_DIM]  # (Dm, Dv)
    w_col  = slab_ref[ROW_WCOL:ROW_WCOL + 1, :]                              # (1, B*N)
    m_rows = slab_ref[ROW_MROWS:ROW_MROWS + B, :]                            # (B, B*N)

    # ---- relayout x from the HBM-contiguous (B*Dm, N) view to lane-dense (Dm, B*N) ----
    x_cf = jnp.concatenate(
        [x_ref[b * EMBED_DIM:(b + 1) * EMBED_DIM, :] for b in range(B)], axis=1)

    # ---- fused q/k/v/bias_net 1x1 convs: one (4C, Dm) @ (Dm, B*N) MXU matmul ----
    y = jnp.dot(w_cat, x_cf, preferred_element_type=jnp.float32) + b_cat
    q = y[0:Q_DIM]
    k = y[Q_DIM:2 * Q_DIM]
    v = y[2 * Q_DIM:2 * Q_DIM + V_DIM]
    bias_tok = y[2 * Q_DIM + V_DIM:]

    # ---- phi(x) = relu(x)^2 * ||relu(x)||_F / ||relu(x)^2||_F (global norms, like torch.norm) ----
    rq = jnp.maximum(q, 0.0); rq2 = rq * rq
    rk = jnp.maximum(k, 0.0); rk2 = rk * rk
    # fused reductions: one lane reduce over the stacked slab, then four tiny sublane reduces
    stack4 = jnp.concatenate([rq2, rq2 * rq2, rk2, rk2 * rk2], axis=0)       # (4*Dq, B*N)
    red = jnp.sum(stack4, axis=1, keepdims=True)                             # (4*Dq, 1)
    sq2 = jnp.sum(red[0:Q_DIM]);             sq4 = jnp.sum(red[Q_DIM:2 * Q_DIM])
    sk2 = jnp.sum(red[2 * Q_DIM:3 * Q_DIM]); sk4 = jnp.sum(red[3 * Q_DIM:4 * Q_DIM])
    cq = jnp.sqrt(sq2) * lax.rsqrt(sq4 + PHI_EPS)
    ck = jnp.sqrt(sk2) * lax.rsqrt(sk4 + PHI_EPS)
    phi_q = rq2 * cq
    phi_kw = rk2 * (ck * w_col)              # bilinear pool-to-1x1 weights folded in

    # ---- both batches' KV blocks in ONE contraction ----
    # stack per-batch masked phi_K along sublanes: (B*Dq, B*N)
    phi_kw_stacked = jnp.concatenate(
        [phi_kw * m_rows[b:b + 1, :] for b in range(B)], axis=0)
    # KV[dv, b*Dq+dq] = sum_{p in batch b} w[p] * phi_K[dq, p] * V[dv, p]
    kv_wide = lax.dot_general(v, phi_kw_stacked, (((1,), (1,)), ((), ())),
                              preferred_element_type=jnp.float32)           # (Dv, B*Dq)
    kv_wide = jnp.clip(kv_wide, -ABS_MAX, ABS_MAX) * hmask

    # ---- both batches' QKV in ONE matmul ----
    phi_q_stacked = jnp.concatenate(
        [phi_q * m_rows[b:b + 1, :] for b in range(B)], axis=0)              # (B*Dq, B*N)
    qkv = jnp.dot(kv_wide, phi_q_stacked, preferred_element_type=jnp.float32)  # (Dv, B*N)

    # ---- attention bias: AvgPool over each batch's spatial extent + LayerNorm(Dv) (affine) ----
    bias_pool = jnp.dot(bias_tok, mask_t,
                        preferred_element_type=jnp.float32) * (1.0 / N)      # (Dv, B)
    bmu = jnp.mean(bias_pool, axis=0, keepdims=True)                         # (1, B)
    bd = bias_pool - bmu
    bvar = jnp.mean(bd * bd, axis=0, keepdims=True)
    bias_n = bd * lax.rsqrt(bvar + EPS) * ln_w + ln_b                        # (Dv, B)
    bias_bc = sum(bias_n[:, b:b + 1] * m_rows[b:b + 1, :] for b in range(B))  # (Dv, B*N)
    qkv = qkv + bias_bc

    # ---- head unification (1x1 conv) + depthwise-1x1 conv residual on V ----
    hu = jnp.dot(w_hu, qkv, preferred_element_type=jnp.float32) + b_hu
    yv = hu + v * dwc_w + dwc_b                                              # (Dm, B*N)

    # ---- final LayerNorm over (C, H, W) per sample, no affine ----
    inv_cnt = 1.0 / (EMBED_DIM * N)
    ch_sums = jnp.dot(yv, mask_t, preferred_element_type=jnp.float32)        # (Dm, B)
    mu = jnp.sum(ch_sums, axis=0, keepdims=True) * inv_cnt                   # (1, B)
    mu_bc = sum(mu[:, b:b + 1] * m_rows[b:b + 1, :] for b in range(B))       # (1, B*N)
    d = yv - mu_bc
    ch_sq = jnp.dot(d * d, mask_t, preferred_element_type=jnp.float32)       # (Dm, B)
    var = jnp.sum(ch_sq, axis=0, keepdims=True) * inv_cnt                    # (1, B)
    inv_std = lax.rsqrt(var + EPS)                                           # (1, B)
    inv_bc = sum(inv_std[:, b:b + 1] * m_rows[b:b + 1, :] for b in range(B))
    out = d * inv_bc                                                         # (Dm, B*N)

    # ---- emit in the HBM-contiguous (B*Dm, N) layout (reshapes to (B,Dm,H,W) for free) ----
    for b in range(B):
        o_ref[b * EMBED_DIM:(b + 1) * EMBED_DIM, :] = out[:, b * N:(b + 1) * N]


# ---------------- wrapper (no transposes: only free reshapes around the call) ----------------
def fc_attention_forward(x, slab):
    Bx, Dm, Hx, Wx = x.shape
    assert Bx == B and Dm == EMBED_DIM and (Hx, Wx) == INTERNAL_RES
    x_flat = x.reshape(Bx * Dm, Hx * Wx)          # contiguous view, no copy
    out_flat = pl.pallas_call(
        fc_attn_kernel,
        out_shape=jax.ShapeDtypeStruct((Bx * Dm, Hx * Wx), jnp.float32),
        in_specs=[pl.BlockSpec(memory_space=pltpu.MemorySpace.VMEM),
                  pl.BlockSpec(memory_space=pltpu.MemorySpace.VMEM)],
        out_specs=pl.BlockSpec(memory_space=pltpu.MemorySpace.VMEM),
    )(x_flat, slab)
    return out_flat.reshape(Bx, Dm, Hx, Wx)       # contiguous view, no copy


# ---------------- parameter init (module-style) + one-time packing ----------------
def init_params(key):
    ks = jax.random.split(key, 12)

    def w(k, shape, scale=0.1):
        return (scale * jax.random.normal(k, shape)).astype(jnp.float32)

    return dict(
        wq=w(ks[0], (Q_DIM, EMBED_DIM)), bq=w(ks[1], (Q_DIM,)),
        wk=w(ks[2], (Q_DIM, EMBED_DIM)), bk=w(ks[3], (Q_DIM,)),
        wv=w(ks[4], (V_DIM, EMBED_DIM)), bv=w(ks[5], (V_DIM,)),
        wb=w(ks[6], (V_DIM, EMBED_DIM)), bb=w(ks[7], (V_DIM,)),      # bias_net conv
        ln_w=jnp.ones((V_DIM,), jnp.float32),                        # bias_norm LayerNorm defaults
        ln_b=jnp.zeros((V_DIM,), jnp.float32),
        w_hu=w(ks[8], (EMBED_DIM, V_DIM)), b_hu=w(ks[9], (EMBED_DIM,)),
        dwc_w=w(ks[10], (DVH,)), dwc_b=w(ks[11], (DVH,)),            # depthwise 1x1 conv (groups=Dvh)
    )


def pack_params(params):
    """Pack ALL module params + precomputed masks into one lane-dense slab (done once)."""
    w_cat = np.concatenate([np.asarray(params["wq"]), np.asarray(params["wk"]),
                            np.asarray(params["wv"]), np.asarray(params["wb"])], axis=0)
    b_cat = np.concatenate([np.asarray(params["bq"]), np.asarray(params["bk"]),
                            np.asarray(params["bv"]), np.asarray(params["bb"])])

    wy = _bilinear_to_one_weights(H)
    wx = _bilinear_to_one_weights(W)
    w_sp = np.outer(wy, wx).reshape(-1).astype(np.float32)            # (N,)

    # block-diagonal head mask, tiled once per batch
    dv = np.arange(V_DIM)[:, None] // DVH
    dq = np.arange(Q_DIM)[None, :] // DQH
    hm = (dv == dq).astype(np.float32)

    slab = np.zeros((SLAB_ROWS, BN), np.float32)
    slab[0:4 * Q_DIM, COL_WCAT:COL_WCAT + EMBED_DIM] = w_cat
    slab[0:4 * Q_DIM, COL_BCAT] = b_cat
    slab[0:V_DIM, COL_HMASK:COL_HMASK + B * Q_DIM] = np.tile(hm, (1, B))
    slab[0:V_DIM, COL_LNW] = np.asarray(params["ln_w"])
    slab[0:V_DIM, COL_LNB] = np.asarray(params["ln_b"])
    slab[0:EMBED_DIM, COL_BHU] = np.asarray(params["b_hu"])
    slab[0:V_DIM, COL_DWCW] = np.tile(np.asarray(params["dwc_w"]), NUM_HEADS)
    slab[0:V_DIM, COL_DWCB] = np.tile(np.asarray(params["dwc_b"]), NUM_HEADS)
    slab[ROW_WHU:ROW_WHU + EMBED_DIM, COL_WHU:COL_WHU + V_DIM] = np.asarray(params["w_hu"])
    slab[ROW_WCOL, :] = np.tile(w_sp, B)
    for b in range(B):
        slab[b * N:(b + 1) * N, COL_MASKT + b] = 1.0     # indicator columns
        slab[ROW_MROWS + b, b * N:(b + 1) * N] = 1.0     # indicator rows
    return jnp.asarray(slab), jnp.asarray(w_sp)


# ---------------- plain-JAX reference (correctness sanity check) ----------------
def fc_attention_reference(x, p, w_sp):
    hp = jax.lax.Precision.HIGHEST
    Bx, Dm, Hx, Wx = x.shape
    Nx = Hx * Wx
    xt = x.reshape(Bx, Dm, Nx)

    def conv(wm, bm):
        return jnp.einsum("oc,bcn->bon", wm, xt, precision=hp) + bm[None, :, None]

    q = conv(p["wq"], p["bq"]); k = conv(p["wk"], p["bk"]); v = conv(p["wv"], p["bv"])
    bias_map = conv(p["wb"], p["bb"])

    def phi(t):
        r = jnp.maximum(t, 0.0)
        r2 = r * r
        return r2 * jnp.sqrt(jnp.sum(r2)) / jnp.sqrt(jnp.sum(r2 * r2))

    phq = phi(q).reshape(Bx, NUM_HEADS, DQH, Nx)
    phk = phi(k).reshape(Bx, NUM_HEADS, DQH, Nx)
    v_h = v.reshape(Bx, NUM_HEADS, DVH, Nx)

    kv = jnp.einsum("bhqn,bhvn,n->bhqv", phk, v_h, w_sp, precision=hp)
    kv = jnp.clip(kv, -ABS_MAX, ABS_MAX)
    qkv = jnp.einsum("bhqv,bhqn->bhvn", kv, phq, precision=hp).reshape(Bx, V_DIM, Nx)

    bias_pool = bias_map.mean(axis=2)                                  # (B, Dv)
    mu = bias_pool.mean(-1, keepdims=True)
    var = ((bias_pool - mu) ** 2).mean(-1, keepdims=True)
    bias = (bias_pool - mu) / jnp.sqrt(var + EPS) * p["ln_w"] + p["ln_b"]
    qkv = qkv + bias[:, :, None]

    hu = jnp.einsum("ov,bvn->bon", p["w_hu"], qkv, precision=hp) + p["b_hu"][None, :, None]
    dw = jnp.tile(p["dwc_w"], NUM_HEADS); db = jnp.tile(p["dwc_b"], NUM_HEADS)
    yv = hu + v * dw[None, :, None] + db[None, :, None]

    mu = yv.mean(axis=(1, 2), keepdims=True)
    var = ((yv - mu) ** 2).mean(axis=(1, 2), keepdims=True)
    out = (yv - mu) / jnp.sqrt(var + EPS)
    return out.reshape(Bx, EMBED_DIM, Hx, Wx)


# TODO(synk): the PyTorch module's runtime isinf() checks / debug prints are
# data-dependent host control flow and are intentionally not reproduced.

if __name__ == "__main__":
    key = jax.random.PRNGKey(0)
    kx, kp = jax.random.split(key)
    params = init_params(kp)
    slab, w_sp = pack_params(params)
    x = jax.random.normal(kx, (B, EMBED_DIM, H, W), dtype=jnp.float32)

    out = jax.jit(lambda xx: fc_attention_forward(xx, slab))(x)
    jax.block_until_ready(out)
    assert out.shape == (B, EMBED_DIM, H, W)
    assert bool(jnp.all(jnp.isfinite(out)))

    ref = jax.jit(lambda xx: fc_attention_reference(xx, params, w_sp))(x)
    jax.block_until_ready(ref)
    max_err = float(jnp.max(jnp.abs(out - ref)))
    assert max_err < 2e-2, f"mismatch vs reference: {max_err}"

    print("KERNEL_OK")
</pallas_src>

<mosaic_0001>
module attributes {stable_mosaic.version = 11 : i64} {
  func.func @fc_attn_kernel(%arg0: memref<64x64xf32, #tpu.memory_space<vmem>>, %arg1: memref<136x128xf32, #tpu.memory_space<vmem>>, %arg2: memref<64x64xf32, #tpu.memory_space<vmem>>) attributes {dimension_semantics = [], scalar_prefetch = 0 : i64, scratch_operands = 0 : i64, tpu.core_type = #tpu.core_type<tc>} {
    %c0 = arith.constant 0 : index
    %c0_0 = arith.constant 0 : index
    %0 = vector.load %arg1[%c0, %c0_0] : memref<136x128xf32, #tpu.memory_space<vmem>>, vector<128x32xf32>
    %c0_1 = arith.constant 0 : index
    %c127 = arith.constant 127 : index
    %1 = vector.load %arg1[%c0_1, %c127] : memref<136x128xf32, #tpu.memory_space<vmem>>, vector<128x1xf32>
    %c0_2 = arith.constant 0 : index
    %c104 = arith.constant 104 : index
    %2 = vector.load %arg1[%c0_2, %c104] : memref<136x128xf32, #tpu.memory_space<vmem>>, vector<128x2xf32>
    %c0_3 = arith.constant 0 : index
    %c32 = arith.constant 32 : index
    %3 = vector.load %arg1[%c0_3, %c32] : memref<136x128xf32, #tpu.memory_space<vmem>>, vector<32x64xf32>
    %c0_4 = arith.constant 0 : index
    %c96 = arith.constant 96 : index
    %4 = vector.load %arg1[%c0_4, %c96] : memref<136x128xf32, #tpu.memory_space<vmem>>, vector<32x1xf32>
    %c0_5 = arith.constant 0 : index
    %c97 = arith.constant 97 : index
    %5 = vector.load %arg1[%c0_5, %c97] : memref<136x128xf32, #tpu.memory_space<vmem>>, vector<32x1xf32>
    %c0_6 = arith.constant 0 : index
    %c98 = arith.constant 98 : index
    %6 = vector.load %arg1[%c0_6, %c98] : memref<136x128xf32, #tpu.memory_space<vmem>>, vector<32x1xf32>
    %c0_7 = arith.constant 0 : index
    %c99 = arith.constant 99 : index
    %7 = vector.load %arg1[%c0_7, %c99] : memref<136x128xf32, #tpu.memory_space<vmem>>, vector<32x1xf32>
    %c0_8 = arith.constant 0 : index
    %c100 = arith.constant 100 : index
    %8 = vector.load %arg1[%c0_8, %c100] : memref<136x128xf32, #tpu.memory_space<vmem>>, vector<32x1xf32>
    %c32_9 = arith.constant 32 : index
    %c32_10 = arith.constant 32 : index
    %9 = vector.load %arg1[%c32_9, %c32_10] : memref<136x128xf32, #tpu.memory_space<vmem>>, vector<32x32xf32>
    %c128 = arith.constant 128 : index
    %c0_11 = arith.constant 0 : index
    %10 = vector.load %arg1[%c128, %c0_11] : memref<136x128xf32, #tpu.memory_space<vmem>>, vector<1x128xf32>
    %c129 = arith.constant 129 : index
    %c0_12 = arith.constant 0 : index
    %11 = vector.load %arg1[%c129, %c0_12] : memref<136x128xf32, #tpu.memory_space<vmem>>, vector<2x128xf32>
    %c0_13 = arith.constant 0 : index
    %c0_14 = arith.constant 0 : index
    %12 = vector.load %arg0[%c0_13, %c0_14] : memref<64x64xf32, #tpu.memory_space<vmem>>, vector<32x64xf32>
    %c32_15 = arith.constant 32 : index
    %c0_16 = arith.constant 0 : index
    %13 = vector.load %arg0[%c32_15, %c0_16] : memref<64x64xf32, #tpu.memory_space<vmem>>, vector<32x64xf32>
    %14 = tpu.concatenate %12, %13 in 1 : vector<32x64xf32>, vector<32x64xf32> -> vector<32x128xf32>
    %cst = arith.constant dense<0.000000e+00> : vector<128x128xf32>
    %15 = tpu.matmul %0, %14, %cst {dimension_numbers = #tpu.dot_dimension_numbers<[1], [0], [0], [1], [0, 0, 1, 1], [], []>} : vector<128x32xf32>, vector<32x128xf32>, vector<128x128xf32> -> vector<128x128xf32>
    %16 = vector.broadcast %1 : vector<128x1xf32> to vector<128x128xf32>
    %17 = arith.addf %15, %16 : vector<128x128xf32>
    %18 = vector.extract_strided_slice %17 {offsets = [0, 0], sizes = [32, 128], strides = [1, 1]} : vector<128x128xf32> to vector<32x128xf32>
    %19 = vector.extract_strided_slice %17 {offsets = [32, 0], sizes = [32, 128], strides = [1, 1]} : vector<128x128xf32> to vector<32x128xf32>
    %20 = vector.extract_strided_slice %17 {offsets = [64, 0], sizes = [32, 128], strides = [1, 1]} : vector<128x128xf32> to vector<32x128xf32>
    %21 = vector.extract_strided_slice %17 {offsets = [96, 0], sizes = [32, 128], strides = [1, 1]} : vector<128x128xf32> to vector<32x128xf32>
    %cst_17 = arith.constant 0.000000e+00 : f32
    %22 = vector.broadcast %cst_17 : f32 to vector<32x128xf32>
    %23 = arith.maximumf %18, %22 : vector<32x128xf32>
    %24 = arith.mulf %23, %23 : vector<32x128xf32>
    %cst_18 = arith.constant 0.000000e+00 : f32
    %25 = vector.broadcast %cst_18 : f32 to vector<32x128xf32>
    %26 = arith.maximumf %19, %25 : vector<32x128xf32>
    %27 = arith.mulf %26, %26 : vector<32x128xf32>
    %28 = arith.mulf %24, %24 : vector<32x128xf32>
    %29 = arith.mulf %27, %27 : vector<32x128xf32>
    %30 = tpu.concatenate %24, %28, %27, %29 in 0 : vector<32x128xf32>, vector<32x128xf32>, vector<32x128xf32>, vector<32x128xf32> -> vector<128x128xf32>
    %cst_19 = arith.constant dense<0.000000e+00> : vector<128xf32>
    %31 = vector.multi_reduction <add>, %30, %cst_19 [1] : vector<128x128xf32> to vector<128xf32>
    %32 = vector.shape_cast %31 : vector<128xf32> to vector<128x1xf32>
    %33 = vector.extract_strided_slice %32 {offsets = [0, 0], sizes = [32, 1], strides = [1, 1]} : vector<128x1xf32> to vector<32x1xf32>
    %34 = vector.shape_cast %33 : vector<32x1xf32> to vector<1x32x1xf32>
    %cst_20 = arith.constant dense<0.000000e+00> : vector<1xf32>
    %35 = vector.multi_reduction <add>, %34, %cst_20 [1, 2] : vector<1x32x1xf32> to vector<1xf32>
    %36 = vector.shape_cast %35 : vector<1xf32> to vector<1x1x1xf32>
    %37 = vector.extract %36[0, 0, 0] : f32 from vector<1x1x1xf32>
    %38 = vector.extract_strided_slice %32 {offsets = [32, 0], sizes = [32, 1], strides = [1, 1]} : vector<128x1xf32> to vector<32x1xf32>
    %39 = vector.shape_cast %38 : vector<32x1xf32> to vector<1x32x1xf32>
    %cst_21 = arith.constant dense<0.000000e+00> : vector<1xf32>
    %40 = vector.multi_reduction <add>, %39, %cst_21 [1, 2] : vector<1x32x1xf32> to vector<1xf32>
    %41 = vector.shape_cast %40 : vector<1xf32> to vector<1x1x1xf32>
    %42 = vector.extract %41[0, 0, 0] : f32 from vector<1x1x1xf32>
    %43 = vector.extract_strided_slice %32 {offsets = [64, 0], sizes = [32, 1], strides = [1, 1]} : vector<128x1xf32> to vector<32x1xf32>
    %44 = vector.shape_cast %43 : vector<32x1xf32> to vector<1x32x1xf32>
    %cst_22 = arith.constant dense<0.000000e+00> : vector<1xf32>
    %45 = vector.multi_reduction <add>, %44, %cst_22 [1, 2] : vector<1x32x1xf32> to vector<1xf32>
    %46 = vector.shape_cast %45 : vector<1xf32> to vector<1x1x1xf32>
    %47 = vector.extract %46[0, 0, 0] : f32 from vector<1x1x1xf32>
    %48 = vector.extract_strided_slice %32 {offsets = [96, 0], sizes = [32, 1], strides = [1, 1]} : vector<128x1xf32> to vector<32x1xf32>
    %49 = vector.shape_cast %48 : vector<32x1xf32> to vector<1x32x1xf32>
    %cst_23 = arith.constant dense<0.000000e+00> : vector<1xf32>
    %50 = vector.multi_reduction <add>, %49, %cst_23 [1, 2] : vector<1x32x1xf32> to vector<1xf32>
    %51 = vector.shape_cast %50 : vector<1xf32> to vector<1x1x1xf32>
    %52 = vector.extract %51[0, 0, 0] : f32 from vector<1x1x1xf32>
    %53 = math.sqrt %37 : f32
    %cst_24 = arith.constant 1.000000e-30 : f32
    %54 = arith.addf %42, %cst_24 : f32
    %55 = math.rsqrt %54 : f32
    %56 = arith.mulf %53, %55 : f32
    %57 = math.sqrt %47 : f32
    %cst_25 = arith.constant 1.000000e-30 : f32
    %58 = arith.addf %52, %cst_25 : f32
    %59 = math.rsqrt %58 : f32
    %60 = arith.mulf %57, %59 : f32
    %61 = vector.broadcast %56 : f32 to vector<32x128xf32>
    %62 = arith.mulf %24, %61 : vector<32x128xf32>
    %63 = vector.broadcast %60 : f32 to vector<1x128xf32>
    %64 = arith.mulf %63, %10 : vector<1x128xf32>
    %65 = vector.broadcast %64 : vector<1x128xf32> to vector<32x128xf32>
    %66 = arith.mulf %27, %65 : vector<32x128xf32>
    %67 = vector.extract_strided_slice %11 {offsets = [0, 0], sizes = [1, 128], strides = [1, 1]} : vector<2x128xf32> to vector<1x128xf32>
    %68 = vector.broadcast %67 : vector<1x128xf32> to vector<32x128xf32>
    %69 = arith.mulf %66, %68 : vector<32x128xf32>
    %70 = vector.extract_strided_slice %11 {offsets = [1, 0], sizes = [1, 128], strides = [1, 1]} : vector<2x128xf32> to vector<1x128xf32>
    %71 = vector.broadcast %70 : vector<1x128xf32> to vector<32x128xf32>
    %72 = arith.mulf %66, %71 : vector<32x128xf32>
    %73 = tpu.concatenate %69, %72 in 0 : vector<32x128xf32>, vector<32x128xf32> -> vector<64x128xf32>
    %cst_26 = arith.constant dense<0.000000e+00> : vector<32x64xf32>
    %74 = tpu.matmul %20, %73, %cst_26 {dimension_numbers = #tpu.dot_dimension_numbers<[1], [1], [0], [0], [0, 0, 1, 0], [], []>} : vector<32x128xf32>, vector<64x128xf32>, vector<32x64xf32> -> vector<32x64xf32>
    %cst_27 = arith.constant -3.200000e+01 : f32
    %cst_28 = arith.constant 3.200000e+01 : f32
    %75 = vector.broadcast %cst_27 : f32 to vector<32x64xf32>
    %76 = arith.maximumf %75, %74 : vector<32x64xf32>
    %77 = vector.broadcast %cst_28 : f32 to vector<32x64xf32>
    %78 = arith.minimumf %77, %76 : vector<32x64xf32>
    %79 = arith.mulf %78, %3 : vector<32x64xf32>
    %80 = vector.extract_strided_slice %11 {offsets = [0, 0], sizes = [1, 128], strides = [1, 1]} : vector<2x128xf32> to vector<1x128xf32>
    %81 = vector.broadcast %80 : vector<1x128xf32> to vector<32x128xf32>
    %82 = arith.mulf %62, %81 : vector<32x128xf32>
    %83 = vector.extract_strided_slice %11 {offsets = [1, 0], sizes = [1, 128], strides = [1, 1]} : vector<2x128xf32> to vector<1x128xf32>
    %84 = vector.broadcast %83 : vector<1x128xf32> to vector<32x128xf32>
    %85 = arith.mulf %62, %84 : vector<32x128xf32>
    %86 = tpu.concatenate %82, %85 in 0 : vector<32x128xf32>, vector<32x128xf32> -> vector<64x128xf32>
    %cst_29 = arith.constant dense<0.000000e+00> : vector<32x128xf32>
    %87 = tpu.matmul %79, %86, %cst_29 {dimension_numbers = #tpu.dot_dimension_numbers<[1], [0], [0], [1], [0, 0, 1, 1], [], []>} : vector<32x64xf32>, vector<64x128xf32>, vector<32x128xf32> -> vector<32x128xf32>
    %cst_30 = arith.constant dense<0.000000e+00> : vector<32x2xf32>
    %88 = tpu.matmul %21, %2, %cst_30 {dimension_numbers = #tpu.dot_dimension_numbers<[1], [0], [0], [1], [0, 0, 1, 1], [], []>} : vector<32x128xf32>, vector<128x2xf32>, vector<32x2xf32> -> vector<32x2xf32>
    %cst_31 = arith.constant 1.562500e-02 : f32
    %89 = vector.broadcast %cst_31 : f32 to vector<32x2xf32>
    %90 = arith.mulf %88, %89 : vector<32x2xf32>
    %cst_32 = arith.constant dense<0.000000e+00> : vector<2xf32>
    %91 = vector.multi_reduction <add>, %90, %cst_32 [0] : vector<32x2xf32> to vector<2xf32>
    %92 = vector.shape_cast %91 : vector<2xf32> to vector<1x2xf32>
    %cst_33 = arith.constant 3.200000e+01 : f32
    %93 = vector.broadcast %cst_33 : f32 to vector<1x2xf32>
    %94 = arith.divf %92, %93 : vector<1x2xf32>
    %95 = vector.broadcast %94 : vector<1x2xf32> to vector<32x2xf32>
    %96 = arith.subf %90, %95 : vector<32x2xf32>
    %97 = arith.mulf %96, %96 : vector<32x2xf32>
    %cst_34 = arith.constant dense<0.000000e+00> : vector<2xf32>
    %98 = vector.multi_reduction <add>, %97, %cst_34 [0] : vector<32x2xf32> to vector<2xf32>
    %99 = vector.shape_cast %98 : vector<2xf32> to vector<1x2xf32>
    %cst_35 = arith.constant 3.200000e+01 : f32
    %100 = vector.broadcast %cst_35 : f32 to vector<1x2xf32>
    %101 = arith.divf %99, %100 : vector<1x2xf32>
    %cst_36 = arith.constant 9.99999974E-6 : f32
    %102 = vector.broadcast %cst_36 : f32 to vector<1x2xf32>
    %103 = arith.addf %101, %102 : vector<1x2xf32>
    %104 = math.rsqrt %103 : vector<1x2xf32>
    %105 = vector.broadcast %104 : vector<1x2xf32> to vector<32x2xf32>
    %106 = arith.mulf %96, %105 : vector<32x2xf32>
    %107 = vector.broadcast %4 : vector<32x1xf32> to vector<32x2xf32>
    %108 = arith.mulf %106, %107 : vector<32x2xf32>
    %109 = vector.broadcast %5 : vector<32x1xf32> to vector<32x2xf32>
    %110 = arith.addf %108, %109 : vector<32x2xf32>
    %111 = vector.extract_strided_slice %110 {offsets = [0, 0], sizes = [32, 1], strides = [1, 1]} : vector<32x2xf32> to vector<32x1xf32>
    %112 = vector.extract_strided_slice %11 {offsets = [0, 0], sizes = [1, 128], strides = [1, 1]} : vector<2x128xf32> to vector<1x128xf32>
    %113 = vector.broadcast %111 : vector<32x1xf32> to vector<32x128xf32>
    %114 = vector.broadcast %112 : vector<1x128xf32> to vector<32x128xf32>
    %115 = arith.mulf %113, %114 : vector<32x128xf32>
    %cst_37 = arith.constant 0.000000e+00 : f32
    %116 = vector.broadcast %cst_37 : f32 to vector<32x128xf32>
    %117 = arith.addf %116, %115 : vector<32x128xf32>
    %118 = vector.extract_strided_slice %110 {offsets = [0, 1], sizes = [32, 1], strides = [1, 1]} : vector<32x2xf32> to vector<32x1xf32>
    %119 = vector.extract_strided_slice %11 {offsets = [1, 0], sizes = [1, 128], strides = [1, 1]} : vector<2x128xf32> to vector<1x128xf32>
    %120 = vector.broadcast %118 : vector<32x1xf32> to vector<32x128xf32>
    %121 = vector.broadcast %119 : vector<1x128xf32> to vector<32x128xf32>
    %122 = arith.mulf %120, %121 : vector<32x128xf32>
    %123 = arith.addf %117, %122 : vector<32x128xf32>
    %124 = arith.addf %87, %123 : vector<32x128xf32>
    %cst_38 = arith.constant dense<0.000000e+00> : vector<32x128xf32>
    %125 = tpu.matmul %9, %124, %cst_38 {dimension_numbers = #tpu.dot_dimension_numbers<[1], [0], [0], [1], [0, 0, 1, 1], [], []>} : vector<32x32xf32>, vector<32x128xf32>, vector<32x128xf32> -> vector<32x128xf32>
    %126 = vector.broadcast %6 : vector<32x1xf32> to vector<32x128xf32>
    %127 = arith.addf %125, %126 : vector<32x128xf32>
    %128 = vector.broadcast %7 : vector<32x1xf32> to vector<32x128xf32>
    %129 = arith.mulf %20, %128 : vector<32x128xf32>
    %130 = arith.addf %127, %129 : vector<32x128xf32>
    %131 = vector.broadcast %8 : vector<32x1xf32> to vector<32x128xf32>
    %132 = arith.addf %130, %131 : vector<32x128xf32>
    %cst_39 = arith.constant dense<0.000000e+00> : vector<32x2xf32>
    %133 = tpu.matmul %132, %2, %cst_39 {dimension_numbers = #tpu.dot_dimension_numbers<[1], [0], [0], [1], [0, 0, 1, 1], [], []>} : vector<32x128xf32>, vector<128x2xf32>, vector<32x2xf32> -> vector<32x2xf32>
    %cst_40 = arith.constant dense<0.000000e+00> : vector<2xf32>
    %134 = vector.multi_reduction <add>, %133, %cst_40 [0] : vector<32x2xf32> to vector<2xf32>
    %135 = vector.shape_cast %134 : vector<2xf32> to vector<1x2xf32>
    %cst_41 = arith.constant 4.8828125E-4 : f32
    %136 = vector.broadcast %cst_41 : f32 to vector<1x2xf32>
    %137 = arith.mulf %135, %136 : vector<1x2xf32>
    %138 = vector.extract_strided_slice %137 {offsets = [0, 0], sizes = [1, 1], strides = [1, 1]} : vector<1x2xf32> to vector<1x1xf32>
    %139 = vector.extract_strided_slice %11 {offsets = [0, 0], sizes = [1, 128], strides = [1, 1]} : vector<2x128xf32> to vector<1x128xf32>
    %140 = vector.broadcast %138 : vector<1x1xf32> to vector<1x128xf32>
    %141 = arith.mulf %140, %139 : vector<1x128xf32>
    %cst_42 = arith.constant 0.000000e+00 : f32
    %142 = vector.broadcast %cst_42 : f32 to vector<1x128xf32>
    %143 = arith.addf %142, %141 : vector<1x128xf32>
    %144 = vector.extract_strided_slice %137 {offsets = [0, 1], sizes = [1, 1], strides = [1, 1]} : vector<1x2xf32> to vector<1x1xf32>
    %145 = vector.extract_strided_slice %11 {offsets = [1, 0], sizes = [1, 128], strides = [1, 1]} : vector<2x128xf32> to vector<1x128xf32>
    %146 = vector.broadcast %144 : vector<1x1xf32> to vector<1x128xf32>
    %147 = arith.mulf %146, %145 : vector<1x128xf32>
    %148 = arith.addf %143, %147 : vector<1x128xf32>
    %149 = vector.broadcast %148 : vector<1x128xf32> to vector<32x128xf32>
    %150 = arith.subf %132, %149 : vector<32x128xf32>
    %151 = arith.mulf %150, %150 : vector<32x128xf32>
    %cst_43 = arith.constant dense<0.000000e+00> : vector<32x2xf32>
    %152 = tpu.matmul %151, %2, %cst_43 {dimension_numbers = #tpu.dot_dimension_numbers<[1], [0], [0], [1], [0, 0, 1, 1], [], []>} : vector<32x128xf32>, vector<128x2xf32>, vector<32x2xf32> -> vector<32x2xf32>
    %cst_44 = arith.constant dense<0.000000e+00> : vector<2xf32>
    %153 = vector.multi_reduction <add>, %152, %cst_44 [0] : vector<32x2xf32> to vector<2xf32>
    %154 = vector.shape_cast %153 : vector<2xf32> to vector<1x2xf32>
    %cst_45 = arith.constant 4.8828125E-4 : f32
    %155 = vector.broadcast %cst_45 : f32 to vector<1x2xf32>
    %156 = arith.mulf %154, %155 : vector<1x2xf32>
    %cst_46 = arith.constant 9.99999974E-6 : f32
    %157 = vector.broadcast %cst_46 : f32 to vector<1x2xf32>
    %158 = arith.addf %156, %157 : vector<1x2xf32>
    %159 = math.rsqrt %158 : vector<1x2xf32>
    %160 = vector.extract_strided_slice %159 {offsets = [0, 0], sizes = [1, 1], strides = [1, 1]} : vector<1x2xf32> to vector<1x1xf32>
    %161 = vector.extract_strided_slice %11 {offsets = [0, 0], sizes = [1, 128], strides = [1, 1]} : vector<2x128xf32> to vector<1x128xf32>
    %162 = vector.broadcast %160 : vector<1x1xf32> to vector<1x128xf32>
    %163 = arith.mulf %162, %161 : vector<1x128xf32>
    %cst_47 = arith.constant 0.000000e+00 : f32
    %164 = vector.broadcast %cst_47 : f32 to vector<1x128xf32>
    %165 = arith.addf %164, %163 : vector<1x128xf32>
    %166 = vector.extract_strided_slice %159 {offsets = [0, 1], sizes = [1, 1], strides = [1, 1]} : vector<1x2xf32> to vector<1x1xf32>
    %167 = vector.extract_strided_slice %11 {offsets = [1, 0], sizes = [1, 128], strides = [1, 1]} : vector<2x128xf32> to vector<1x128xf32>
    %168 = vector.broadcast %166 : vector<1x1xf32> to vector<1x128xf32>
    %169 = arith.mulf %168, %167 : vector<1x128xf32>
    %170 = arith.addf %165, %169 : vector<1x128xf32>
    %171 = vector.broadcast %170 : vector<1x128xf32> to vector<32x128xf32>
    %172 = arith.mulf %150, %171 : vector<32x128xf32>
    %173 = vector.extract_strided_slice %172 {offsets = [0, 0], sizes = [32, 64], strides = [1, 1]} : vector<32x128xf32> to vector<32x64xf32>
    %c0_48 = arith.constant 0 : index
    %c0_49 = arith.constant 0 : index
    %174 = vector.load %arg2[%c0_48, %c0_49] : memref<64x64xf32, #tpu.memory_space<vmem>>, vector<32x64xf32>
    tpu.vector_store %arg2[%c0_48, %c0_49], %173 {strides = array<i32>} : memref<64x64xf32, #tpu.memory_space<vmem>>, vector<32x64xf32>,
    %175 = vector.extract_strided_slice %172 {offsets = [0, 64], sizes = [32, 64], strides = [1, 1]} : vector<32x128xf32> to vector<32x64xf32>
    %c32_50 = arith.constant 32 : index
    %c0_51 = arith.constant 0 : index
    %176 = vector.load %arg2[%c32_50, %c0_51] : memref<64x64xf32, #tpu.memory_space<vmem>>, vector<32x64xf32>
    tpu.vector_store %arg2[%c32_50, %c0_51], %175 {strides = array<i32>} : memref<64x64xf32, #tpu.memory_space<vmem>>, vector<32x64xf32>,
    return
  }
}

</mosaic_0001>

<bundles_post_ra>
// kernel: _lambda_.1
= control target key start
LH: loop header
LB: loop body
LE: loop exit
PB: predicated region body
PF: predicated region fallthrough
CT: control target
= control target key end

     0   :  { %s1202_s13 = smov 64   ;;  %v1203_v7 = vmov 127   ;;  %vm53_vm0 = vcmask 523264   ;;  %vm138_vm1 = vcmask 261120   ;;  %vm292_vm2 = vcmask 7168   ;;  %s1204_s30 = smov 24   ;;  %s1712_s0 = inlined_call_operand.vmem [shape: f32[64,64], index: 0, kind: input, shape index: {}]   ;;  %s1713_s1 = inlined_call_operand.vmem [shape: f32[136,128], index: 1, kind: input, shape index: {}]   ;;  %s1714_s2 = inlined_call_operand.vmem [shape: f32[64,64], index: 2, kind: output, shape index: {}]  }
   0x1   :  { %v35_v0 = vld [vmem:[%s1712_s0 + $0x30] sm:$0xff]  ;;  %v36_v1 = vld [vmem:[%s1712_s0 + $0x38] sm:$0xff]  ;;  %v33_v3 = vld [vmem:[%s1712_s0 + $0x20] sm:$0xff]  ;;  %1115 = vset.pattern.permute.xlu1 %v1203_v7  ;;  %1117 = vset.pattern.permute.xlu0 %v1203_v7  ;;  %s1205_s3 = smov 96   ;;  %vm577_vm13 = vcmask 15360  }
   0x2   :  { %v1105_v2 = vpack.i.bf16 %v35_v0, %v36_v1  ;;  %v34_v4 = vld [vmem:[%s1712_s0 + $0x28] sm:$0xff]  ;;  %v1246_v6 = vld [vmem:[%s1713_s1] sm:$0xff]  ;;  %1116 = vset.pattern.permute.xlu2 %v1203_v7  ;;  %v1252_v8 = vld [vmem:[%s1713_s1 + $0x10] sm:$0xff] }
   0x3   :  { %v1110_v5 = vpack.i.bf16 %v33_v3, %v34_v4  ;;  %60 = vperm.xlu1 %1115, %v1246_v6   ;;  %v1257_v9 = vld [vmem:[%s1713_s1 + $0x8] sm:$0xff]  ;;  %v1264_v10 = vld [vmem:[%s1713_s1 + $0x30] sm:$0xff]  ;;  %v32_v12 = vld [vmem:[%s1712_s0 + $0x18] sm:$0xff] }
   0x4   :  { %1106 = vrot.lane.b32.xlu0 %v1105_v2, %s1202_s13  ;;  %v31_v15 = vld [vmem:[%s1712_s0 + $0x10] sm:$0xff]  ;;  %v1278_v18 = vld [vmem:[%s1713_s1 + $0x38] sm:$0xff]  ;;  %v1283_v19 = vld [vmem:[%s1713_s1 + $0x20] sm:$0xff] }
   0x5   :  { %v30_v21 = vld [vmem:[%s1712_s0 + $0x8] sm:$0xff]  ;;  %80 = vperm.xlu2 %1116, %v1283_v19   ;;  %v29_v24 = vld [vmem:[%s1712_s0] sm:$0xff]  ;;  %v1308_v28 = vld [vmem:[%s1713_s1 + $0x18] sm:$0xff] }
   0x6   :  { %v1300_v27 = vld [vmem:[%s1713_s1 + $0x28] sm:$0xff] }
   0xb   :  { %65 = vperm.xlu1 %1115, %v1257_v9  }
   0xc   :  { %1111 = vrot.lane.b32.xlu0 %v1110_v5, %s1202_s13 }
   0xd   :  { %85 = vperm.xlu2 %1116, %v1300_v27  }
  0x13   :  { %90 = vperm.xlu1 %1115, %v1264_v10  }
  0x14   :  { %70 = vperm.xlu0 %1117, %v1252_v8  }
  0x15   :  { %75 = vperm.xlu2 %1116, %v1308_v28  }
  0x1b   :  { %95 = vperm.xlu1 %1115, %v1278_v18  }
  0x5f   :  { %v81_v32 = vpop.permute.xlu2 %80 }
  0x67   :  { %v86_v40 = vpop.permute.xlu2 %85 }
  0x6f   :  { %v76_v48 = vpop.permute.xlu2 %75 }
  0x75   :  { %v61_v29 = vpop.permute.xlu1 %60 }
  0x76   :  { %v1107_v11 = vpop.permute.xlu0 %1106 }
  0x77   :  { %v1109_v13 = vunpack.i.h.bf16 %v1107_v11  ;;  %v1108_v14 = vunpack.i.l.bf16 %v1107_v11 }
  0x79   :  { %v57_v16 = vsel %vm53_vm0, %v32_v12, %v1108_v14  ;;  %v56_v17 = vsel %vm53_vm0, %v31_v15, %v1109_v13 }
  0x7a   :  { %183 = vmatpush.msra.mxu0 %v57_v16  ;;  %1073 = vmatpush.msra.mxu3 %v57_v16 }
  0x7c   :  { %184 = vmatpush.msra.mxu0 %v56_v17  ;;  %1074 = vmatpush.msra.mxu3 %v56_v17 }
  0x7d   :  { %v66_v36 = vpop.permute.xlu1 %65 }
  0x7e   :  { %v1112_v20 = vpop.permute.xlu0 %1111 }
  0x7f   :  { %v1114_v22 = vunpack.i.h.bf16 %v1112_v20  ;;  %v1113_v23 = vunpack.i.l.bf16 %v1112_v20 }
  0x81   :  { %v55_v25 = vsel %vm53_vm0, %v30_v21, %v1113_v23  ;;  %v54_v26 = vsel %vm53_vm0, %v29_v24, %v1114_v22 }
  0x82   :  { %185 = vmatpush.msra.mxu0 %v55_v25  ;;  %1075 = vmatpush.msra.mxu3 %v55_v25 }
  0x84   :  { %186 = vmatpush.msra.mxu0 %v54_v26  ;;  %1076 = vmatpush.msra.mxu3 %v54_v26 }
  0x85   :  { %1045 = vmatmul.msk.f32.vlgmr.msra.gmra.mxu0 %vm138_vm1, %v1246_v6  ;;  %v91_v63 = vpop.permute.xlu1 %90 }
  0x86   :  { %v71_v42 = vpop.permute.xlu0 %70 }
  0x8d   :  { %1046 = vmatmul.msk.f32.gmra.mxu0 %vm138_vm1, %v1257_v9  ;;  %v96_v7 = vpop.permute.xlu1 %95 }
  0x95   :  { %1047 = vmatmul.msk.f32.gmra.mxu0 %vm138_vm1, %v1252_v8 }
  0x9d   :  { %1048 = vmatmul.msk.f32.gmra.mxu0 %vm138_vm1, %v1308_v28 }
  0xa5   :  { %1049 = vmatmul.msk.f32.gmra.mxu0 %vm138_vm1, %v1283_v19 }
  0xad   :  { %1050 = vmatmul.msk.f32.gmra.mxu0 %vm138_vm1, %v1300_v27 }
  0xb5   :  { %1051 = vmatmul.msk.f32.gmra.mxu0 %vm138_vm1, %v1264_v10 }
  0xbd   :  { %1052 = vmatmul.msk.f32.gmra.mxu0 %vm138_vm1, %v1278_v18 }
 0x102   :  { %v188_v30 = vpop.f32.mrf.mxu0 }
 0x103   :  { %v189_v31 = vadd.f32 %v188_v30, %v61_v29 }
 0x105   :  { %v236_v33 = vmax.f32 %v189_v31, 0.0 }
 0x107   :  { %v1323_v34 = vmul.f32 %v236_v33, %v236_v33 }
 0x109   :  { %260 = vadd.xlane.f32.xlu2 %v1323_v34  ;;  %v252_v35 = vmul.f32 %v1323_v34, %v1323_v34 }
 0x10a   :  { %v191_v37 = vpop.f32.mrf.mxu0 }
 0x10b   :  { %v192_v38 = vadd.f32 %v191_v37, %v66_v36  ;;  %268 = vadd.xlane.f32.xlu1 %v252_v35  ;;  %v19_v36 = vld [vmem:[%s1713_s1 + $0x40] sm:$0xff] }
 0x10c   :  { %v1373_v37 = vld [vmem:[%s1713_s1 + $0x60] sm:$0xff]  ;;  %1053 = vmatmul.msk.f32.gmra.mxu0 %vm138_vm1, %v19_v36 }
 0x10d   :  { %v237_v39 = vmax.f32 %v192_v38, 0.0  ;;  %1057 = vmatmul.msk.f32.vlgmr.msra.gmra.mxu3 %vm138_vm1, %v1373_v37 }
 0x10f   :  { %v1328_v41 = vmul.f32 %v237_v39, %v237_v39  ;;  %v20_v39 = vld [vmem:[%s1713_s1 + $0x48] sm:$0xff] }
 0x111   :  { %262 = vadd.xlane.f32.xlu0 %v1328_v41  ;;  %v253_v43 = vmul.f32 %v1328_v41, %v1328_v41 }
 0x112   :  { %v194_v44 = vpop.f32.mrf.mxu0 }
 0x113   :  { %v195_v45 = vadd.f32 %v194_v44, %v71_v42  ;;  %270 = vadd.xlane.f32.xlu2 %v253_v43  ;;  %v21_v44 = vld [vmem:[%s1713_s1 + $0x50] sm:$0xff] }
 0x114   :  { %1054 = vmatmul.msk.f32.gmra.mxu0 %vm138_vm1, %v20_v39 }
 0x115   :  { %v238_v46 = vmax.f32 %v195_v45, 0.0  ;;  %v25_v45 = vld [vmem:[%s1713_s1 + $0x70] sm:$0xff] }
 0x117   :  { %v1333_v47 = vmul.f32 %v238_v46, %v238_v46 }
 0x119   :  { %264 = vadd.xlane.f32.xlu0 %v1333_v47  ;;  %v254_v49 = vmul.f32 %v1333_v47, %v1333_v47 }
 0x11a   :  { %v197_v50 = vpop.f32.mrf.mxu0 }
 0x11b   :  { %v198_v51 = vadd.f32 %v197_v50, %v76_v48  ;;  %272 = vadd.xlane.f32.xlu1 %v254_v49  ;;  %v22_v49 = vld [vmem:[%s1713_s1 + $0x58] sm:$0xff] }
 0x11c   :  { %1055 = vmatmul.msk.f32.gmra.mxu0 %vm138_vm1, %v21_v44 }
 0x11d   :  { %v239_v52 = vmax.f32 %v198_v51, 0.0  ;;  %v26_v51 = vld [vmem:[%s1713_s1 + $0x78] sm:$0xff] }
 0x11f   :  { %v1338_v53 = vmul.f32 %v239_v52, %v239_v52 }
 0x121   :  { %v255_v15 = vmul.f32 %v1338_v53, %v1338_v53 }
 0x122   :  { %v200_v54 = vpop.f32.mrf.mxu0 }
 0x123   :  { %v201_v55 = vadd.f32 %v200_v54, %v81_v32  ;;  %266 = vadd.xlane.f32.xlu1 %v1338_v53 }
 0x124   :  { %1056 = vmatmul.msk.f32.gmra.mxu0 %vm138_vm1, %v22_v49 }
 0x125   :  { %v244_v56 = vmax.f32 %v201_v55, 0.0 }
 0x127   :  { %v1341_v57 = vmul.f32 %v244_v56, %v244_v56 }
 0x129   :  { %276 = vadd.xlane.f32.xlu2 %v1341_v57  ;;  %v256_v58 = vmul.f32 %v1341_v57, %v1341_v57 }
 0x12a   :  { %v203_v59 = vpop.f32.mrf.mxu0 }
 0x12b   :  { %v204_v60 = vadd.f32 %v203_v59, %v86_v40  ;;  %284 = vadd.xlane.f32.xlu1 %v256_v58  ;;  %v1384_v40 = vld [vmem:[%s1713_s1 + $0x68] sm:$0xff] }
 0x12c   :  { %1058 = vmatmul.msk.f32.gmra.mxu3 %vm138_vm1, %v1384_v40 }
 0x12d   :  { %v245_v61 = vmax.f32 %v204_v60, 0.0 }
 0x12f   :  { %v1346_v62 = vmul.f32 %v245_v61, %v245_v61 }
 0x131   :  { %278 = vadd.xlane.f32.xlu0 %v1346_v62  ;;  %v257_v0 = vmul.f32 %v1346_v62, %v1346_v62 }
 0x132   :  { %v206_v1 = vpop.f32.mrf.mxu0 }
 0x133   :  { %v207_v2 = vadd.f32 %v206_v1, %v91_v63  ;;  %286 = vadd.xlane.f32.xlu2 %v257_v0 }
 0x134   :  { %1059 = vmatmul.msk.f32.gmra.mxu3 %vm138_vm1, %v25_v45 }
 0x135   :  { %v246_v3 = vmax.f32 %v207_v2, 0.0 }
 0x137   :  { %v1351_v4 = vmul.f32 %v246_v3, %v246_v3 }
 0x139   :  { %v258_v5 = vmul.f32 %v1351_v4, %v1351_v4 }
 0x13a   :  { %v209_v11 = vpop.f32.mrf.mxu0 }
 0x13b   :  { %v210_v12 = vadd.f32 %v209_v11, %v96_v7  ;;  %288 = vadd.xlane.f32.xlu0 %v258_v5  ;;  %280 = vadd.xlane.f32.xlu2 %v1351_v4 }
 0x13c   :  { %1060 = vmatmul.msk.f32.gmra.mxu3 %vm138_vm1, %v26_v51 }
 0x13d   :  { %v247_v13 = vmax.f32 %v210_v12, 0.0 }
 0x13f   :  { %v1356_v14 = vmul.f32 %v247_v13, %v247_v13 }
 0x141   :  { %v259_v16 = vmul.f32 %v1356_v14, %v1356_v14 }
 0x143   :  { %282 = vadd.xlane.f32.xlu0 %v1356_v14  ;;  %274 = vadd.xlane.f32.xlu2 %v255_v15 }
 0x144   :  { %290 = vadd.xlane.f32.xlu1 %v259_v16 }
 0x17c   :  { %v261_v21 = vpop.xlane.xlu2 %260 }
 0x17d   :  { %v293_v25 = vsel %vm292_vm2, %v261_v21, 0.0 }
 0x17e   :  { %v269_v17 = vpop.xlane.xlu1 %268 }
 0x17f   :  { %v309_v56 = vsel %vm292_vm2, %v269_v17, 0.0 }
 0x184   :  { %v263_v20 = vpop.xlane.xlu0 %262 }
 0x185   :  { %v294_v24 = vsel %vm292_vm2, %v263_v20, 0.0 }
 0x186   :  { %v295_v29 = vadd.f32 %v294_v24, %v293_v25  ;;  %v271_v30 = vpop.xlane.xlu2 %270  ;;  %v1128_v24 = vpack.i.bf16 %v21_v44, %v22_v49  ;;  %v1123_v25 = vpack.i.bf16 %v1373_v37, %v1384_v40 }
 0x187   :  { %v310_v52 = vsel %vm292_vm2, %v271_v30, 0.0  ;;  %v1143_v30 = vpack.i.bf16 %v1283_v19, %v1300_v27 }
 0x188   :  { %v311_v61 = vadd.f32 %v310_v52, %v309_v56 }
 0x18c   :  { %v265_v23 = vpop.xlane.xlu0 %264 }
 0x18d   :  { %v296_v26 = vsel %vm292_vm2, %v265_v23, 0.0  ;;  %v1118_v23 = vpack.i.bf16 %v25_v45, %v26_v51 }
 0x18e   :  { %v273_v22 = vpop.xlane.xlu1 %272  ;;  %v297_v31 = vadd.f32 %v296_v26, %v295_v29  ;;  %v1133_v26 = vpack.i.bf16 %v19_v36, %v20_v39  ;;  %v1138_v29 = vpack.i.bf16 %v1264_v10, %v1278_v18 }
 0x18f   :  { %v312_v58 = vsel %vm292_vm2, %v273_v22, 0.0 }
 0x190   :  { %v313_v3 = vadd.f32 %v312_v58, %v311_v61 }
 0x196   :  { %v267_v32 = vpop.xlane.xlu1 %266 }
 0x197   :  { %v298_v33 = vsel %vm292_vm2, %v267_v32, 0.0  ;;  %v1153_v32 = vpack.i.bf16 %v1246_v6, %v1257_v9 }
 0x198   :  { %v299_v35 = vadd.f32 %v298_v33, %v297_v31  ;;  %v1148_v31 = vpack.i.bf16 %v1252_v8, %v1308_v28 }
 0x19a   :  { %300 = vadd.xlane.f32.xlu2 %v299_v35 }
 0x19c   :  { %v277_v38 = vpop.xlane.xlu2 %276 }
 0x19d   :  { %v325_v59 = vsel %vm292_vm2, %v277_v38, 0.0 }
 0x19e   :  { %v285_v50 = vpop.xlane.xlu1 %284 }
 0x19f   :  { %v341_v63 = vsel %vm292_vm2, %v285_v50, 0.0 }
 0x1a4   :  { %v279_v42 = vpop.xlane.xlu0 %278 }
 0x1a5   :  { %v326_v54 = vsel %vm292_vm2, %v279_v42, 0.0 }
 0x1a6   :  { %v287_v43 = vpop.xlane.xlu2 %286  ;;  %v327_v0 = vadd.f32 %v326_v54, %v325_v59 }
 0x1a7   :  { %v342_v55 = vsel %vm292_vm2, %v287_v43, 0.0 }
 0x1a8   :  { %v343_v2 = vadd.f32 %v342_v55, %v341_v63 }
 0x1ae   :  { %v289_v46 = vpop.xlane.xlu0 %288  ;;  %v281_v48 = vpop.xlane.xlu2 %280 }
 0x1af   :  { %v328_v60 = vsel %vm292_vm2, %v281_v48, 0.0  ;;  %v344_v1 = vsel %vm292_vm2, %v289_v46, 0.0 }
 0x1b0   :  { %v329_v5 = vadd.f32 %v328_v60, %v327_v0  ;;  %v345_v12 = vadd.f32 %v344_v1, %v343_v2 }
 0x1b6   :  { %v283_v7 = vpop.xlane.xlu0 %282  ;;  %v275_v11 = vpop.xlane.xlu2 %274 }
 0x1b7   :  { %v330_v13 = vsel %vm292_vm2, %v283_v7, 0.0  ;;  %v314_v15 = vsel %vm292_vm2, %v275_v11, 0.0  ;;  %v291_v16 = vpop.xlane.xlu1 %290 }
 0x1b8   :  { %v346_v17 = vsel %vm292_vm2, %v291_v16, 0.0  ;;  %v331_v20 = vadd.f32 %v330_v13, %v329_v5  ;;  %v315_v21 = vadd.f32 %v314_v15, %v313_v3 }
 0x1b9   :  { %v347_v22 = vadd.f32 %v346_v17, %v345_v12 }
 0x1ba   :  { %332 = vadd.xlane.f32.xlu1 %v331_v20  ;;  %316 = vadd.xlane.f32.xlu0 %v315_v21 }
 0x1bb   :  { %348 = vadd.xlane.f32.xlu2 %v347_v22 }
 0x1ce   :  { %1119 = vrot.lane.b32.xlu0 %v1118_v23, %s1204_s30 }
 0x1d3   :  { %1129 = vrot.lane.b32.xlu2 %v1128_v24, %s1204_s30  ;;  %1124 = vrot.lane.b32.xlu1 %v1123_v25, %s1204_s30 }
 0x1d6   :  { %100 = vperm.xlu0 %1117, %v19_v36  }
 0x1db   :  { %105 = vperm.xlu2 %1116, %v20_v39   ;;  %1134 = vrot.lane.b32.xlu1 %v1133_v26, %s1204_s30 }
 0x1de   :  { %1139 = vrot.lane.b32.xlu0 %v1138_v29, %s1204_s30 }
 0x1e3   :  { %110 = vperm.xlu2 %1116, %v21_v44   ;;  %1144 = vrot.lane.b32.xlu1 %v1143_v30, %s1204_s30 }
 0x1e6   :  { %1149 = vrot.lane.b32.xlu0 %v1148_v31, %s1204_s30 }
 0x1eb   :  { %115 = vperm.xlu2 %1116, %v22_v49   ;;  %1154 = vrot.lane.b32.xlu1 %v1153_v32, %s1204_s30  ;;  %v224_v32 = vpop.f32.mrf.mxu3 }
 0x1ee   :  { %120 = vperm.xlu0 %1117, %v1373_v37  }
 0x1f3   :  { %135 = vperm.xlu2 %1116, %v26_v51   ;;  %125 = vperm.xlu1 %1115, %v1384_v40  }
 0x1f6   :  { %130 = vperm.xlu0 %1117, %v25_v45  }
 0x1fb   :  { %472 = vrot.lane.b32.xlu1 %v1246_v6, %s1205_s3  ;;  %476 = vrot.lane.b32.xlu2 %v1252_v8, %s1205_s3 }
 0x1fe   :  { %474 = vrot.lane.b32.xlu0 %v1257_v9, %s1205_s3 }
 0x203   :  { %478 = vrot.lane.b32.xlu1 %v1308_v28, %s1205_s3 }
 0x20d   :  { %v301_v10 = vpop.xlane.xlu2 %300 }
 0x20e   :  { %v302_v18 = vrot.slane %v301_v10, 4 }
 0x210   :  { %v303_v19 = vadd.f32 %v302_v18, %v301_v10 }
 0x212   :  { %v304_v27 = vrot.slane %v303_v19, 2 }
 0x214   :  { %v305_v33 = vadd.f32 %v304_v27, %v303_v19 }
 0x216   :  { %v306_v35 = vrot.slane %v305_v33, 1 }
 0x218   :  { %v307_v36 = vadd.f32 %v306_v35, %v305_v33 }
 0x21a   :  { %1077 = vpush %v307_v36 }
 0x22d   :  { %v317_v37 = vpop.xlane.xlu0 %316  ;;  %v333_v38 = vpop.xlane.xlu1 %332 }
 0x22e   :  { %v318_v39 = vrot.slane %v317_v37, 4  ;;  %v349_v40 = vpop.xlane.xlu2 %348  ;;  %v334_v42 = vrot.slane %v333_v38, 4 }
 0x22f   :  { %v350_v43 = vrot.slane %v349_v40, 4 }
 0x230   :  { %v319_v44 = vadd.f32 %v318_v39, %v317_v37  ;;  %v335_v45 = vadd.f32 %v334_v42, %v333_v38 }
 0x231   :  { %v351_v46 = vadd.f32 %v350_v43, %v349_v40 }
 0x232   :  { %v320_v48 = vrot.slane %v319_v44, 2  ;;  %v336_v49 = vrot.slane %v335_v45, 2 }
 0x233   :  { %v352_v50 = vrot.slane %v351_v46, 2 }
 0x234   :  { %v321_v51 = vadd.f32 %v320_v48, %v319_v44  ;;  %v337_v52 = vadd.f32 %v336_v49, %v335_v45  ;;  %v227_v48 = vpop.f32.mrf.mxu3 }
 0x235   :  { %v353_v54 = vadd.f32 %v352_v50, %v351_v46 }
 0x236   :  { %v322_v55 = vrot.slane %v321_v51, 1  ;;  %v338_v56 = vrot.slane %v337_v52, 1  ;;  %v1130_v7 = vpop.permute.xlu2 %1129 }
 0x237   :  { %v354_v58 = vrot.slane %v353_v54, 1  ;;  %v1447_v11 = vunpack.i.l.bf16 %v1130_v7  ;;  %v1452_v13 = vunpack.i.h.bf16 %v1130_v7 }
 0x238   :  { %v323_v59 = vadd.f32 %v322_v55, %v321_v51  ;;  %v339_v60 = vadd.f32 %v338_v56, %v337_v52 }
 0x239   :  { %v355_v61 = vadd.f32 %v354_v58, %v353_v54 }
 0x23a   :  { %1079 = vpush %v323_v59 }
 0x23b   :  { %1081 = vpush %v339_v60 }
 0x23c   :  { %1083 = vpush %v355_v61  ;;  %v230_v52 = vpop.f32.mrf.mxu3 }
 0x23e   :  { %v1473_v10 = vpop.permute.xlu2 %105 }
 0x240   :  { %v1120_v63 = vpop.permute.xlu0 %1119 }
 0x241   :  { %v1437_v0 = vunpack.i.h.bf16 %v1120_v63  ;;  %v1439_v1 = vunpack.i.l.bf16 %v1120_v63 }
 0x243   :  { %544 = vmatpush.msra.mxu2 %v1439_v1 }
 0x244   :  { %v233_v7 = vpop.f32.mrf.mxu3 }
 0x245   :  { %v1125_v2 = vpop.permute.xlu1 %1124  ;;  %545 = vmatpush.msra.mxu2 %v1437_v0 }
 0x246   :  { %v1443_v3 = vunpack.i.h.bf16 %v1125_v2  ;;  %v1445_v5 = vunpack.i.l.bf16 %v1125_v2  ;;  %v1488_v49 = vpop.permute.xlu2 %110 }
 0x248   :  { %v1449_v12 = vpop.permute.xlu0 %100  ;;  %546 = vmatpush.msra.mxu2 %v1445_v5 }
 0x24a   :  { %547 = vmatpush.msra.mxu2 %v1443_v3 }
 0x24b   :  { %s1078_s4 = spop %1077 }
 0x24c   :  { %v357_v15 = vstv %s1078_s4  ;;  %548 = vmatpush.msra.mxu2 %v1447_v11 }
 0x24d   :  { %1180 = vrsqrt.f32 %v357_v15  ;;  %v1135_v16 = vpop.permute.xlu1 %1134  ;;  %vm365_vm3 = vcmp.eq.f32.partialorder %v357_v15, inf  ;;  %v368_v42 = vand.u32 2147483648, %v357_v15  ;;  %vm367_vm4 = vcmp.eq.f32.partialorder %v357_v15, 0.0 }
 0x24e   :  { %v1456_v17 = vunpack.i.h.bf16 %v1135_v16  ;;  %v1458_v20 = vunpack.i.l.bf16 %v1135_v16  ;;  %549 = vmatpush.msra.mxu2 %v1452_v13  ;;  %v1495_v54 = vpop.permute.xlu2 %115 }
 0x250   :  { %v1140_v21 = vpop.permute.xlu0 %1139  ;;  %550 = vmatpush.msra.mxu2 %v1458_v20 }
 0x251   :  { %v1462_v22 = vunpack.i.l.bf16 %v1140_v21  ;;  %v1464_v23 = vunpack.i.h.bf16 %v1140_v21 }
 0x252   :  { %551 = vmatpush.msra.mxu2 %v1456_v17 }
 0x253   :  { %v1181_v24 = vpop.eup %1180 }
 0x254   :  { %v359_v25 = vmul.f32 %v1181_v24, %v357_v15  ;;  %552 = vmatpush.msra.mxu2 %v1462_v22 }
 0x255   :  { %v1145_v26 = vpop.permute.xlu1 %1144 }
 0x256   :  { %v1468_v29 = vunpack.i.h.bf16 %v1145_v26  ;;  %v1470_v30 = vunpack.i.l.bf16 %v1145_v26  ;;  %553 = vmatpush.msra.mxu2 %v1464_v23  ;;  %v360_v31 = vmul.f32 %v1181_v24, %v359_v25 }
 0x258   :  { %v1150_v18 = vpop.permute.xlu0 %1149  ;;  %554 = vmatpush.msra.mxu2 %v1470_v30  ;;  %v361_v19 = vmul.f32 0.5, %v360_v31 }
 0x259   :  { %v1476_v27 = vunpack.i.l.bf16 %v1150_v18  ;;  %v1478_v33 = vunpack.i.h.bf16 %v1150_v18 }
 0x25a   :  { %555 = vmatpush.msra.mxu2 %v1468_v29  ;;  %v362_v35 = vsub.f32 1.5, %v361_v19 }
 0x25c   :  { %556 = vmatpush.msra.mxu2 %v1476_v27  ;;  %v363_v36 = vmul.f32 %v1181_v24, %v362_v35 }
 0x25d   :  { %v1155_v37 = vpop.permute.xlu1 %1154 }
 0x25e   :  { %v1482_v38 = vunpack.i.h.bf16 %v1155_v37  ;;  %v1484_v39 = vunpack.i.l.bf16 %v1155_v37  ;;  %557 = vmatpush.msra.mxu2 %v1478_v33  ;;  %v364_v40 = vmul.f32 %v363_v36, %v357_v15 }
 0x260   :  { %v121_v43 = vpop.permute.xlu0 %120  ;;  %558 = vmatpush.msra.mxu2 %v1484_v39  ;;  %v366_v44 = vsel %vm365_vm3, %v357_v15, %v364_v40  ;;  %v136_v15 = vpop.permute.xlu2 %135 }
 0x261   :  { %v225_v45 = vadd.f32 %v224_v32, %v121_v43  ;;  %v369_v46 = vsel %vm367_vm4, %v368_v42, %v366_v44  ;;  %v234_v31 = vadd.f32 %v233_v7, %v136_v15 }
 0x262   :  { %1085 = vpush %v369_v46  ;;  %559 = vmatpush.msra.mxu2 %v1482_v38 }
 0x263   :  { %560 = vmatmul.f32.vlgmr.msra.gmra.mxu2 %v225_v45 }
 0x264   :  { %942 = vmatpush.msrb.mxu2 %v1439_v1 }
 0x265   :  { %v126_v50 = vpop.permute.xlu1 %125 }
 0x266   :  { %943 = vmatpush.msrb.mxu2 %v1437_v0  ;;  %v228_v51 = vadd.f32 %v227_v48, %v126_v50 }
 0x268   :  { %944 = vmatpush.msrb.mxu2 %v1445_v5  ;;  %v131_v56 = vpop.permute.xlu0 %130 }
 0x269   :  { %v231_v60 = vadd.f32 %v230_v52, %v131_v56  ;;  %v1206_v56 = vmov 97  }
 0x26a   :  { %945 = vmatpush.msrb.mxu2 %v1443_v3  ;;  %1160 = vset.pattern.permute.xlu1 %v1206_v56 }
 0x26b   :  { %s1080_s5 = spop %1079  ;;  %563 = vmatmul.f32.gmra.mxu2 %v228_v51  ;;  %669 = vperm.xlu1 %1160, %v1308_v28  }
 0x26c   :  { %s371_s6 = sadd.f32 1e-30, %s1080_s5  ;;  %s1082_s7 = spop %1081  ;;  %946 = vmatpush.msrb.mxu2 %v1447_v11 }
 0x26d   :  { %v385_v55 = vstv %s1082_s7  ;;  %s1084_s8 = spop %1083 }
 0x26e   :  { %v372_v58 = vstv %s371_s6  ;;  %1182 = vrsqrt.f32 %v385_v55  ;;  %s399_s9 = sadd.f32 1e-30, %s1084_s8  ;;  %947 = vmatpush.msrb.mxu2 %v1452_v13  ;;  %vm393_vm9 = vcmp.eq.f32.partialorder %v385_v55, inf  ;;  %v396_v46 = vand.u32 2147483648, %v385_v55 }
 0x26f   :  { %1184 = vrsqrt.f32 %v372_v58  ;;  %vm379_vm6 = vweird.f32 %v372_v58  ;;  %vm395_vm11 = vcmp.eq.f32.partialorder %v385_v55, 0.0 }
 0x270   :  { %v400_v59 = vstv %s399_s9  ;;  %948 = vmatpush.msrb.mxu2 %v1458_v20 }
 0x271   :  { %1186 = vrsqrt.f32 %v400_v59  ;;  %vm407_vm10 = vweird.f32 %v400_v59 }
 0x272   :  { %949 = vmatpush.msrb.mxu2 %v1456_v17 }
 0x273   :  { %566 = vmatmul.f32.gmra.mxu2 %v231_v60  ;;  %665 = vperm.xlu1 %1160, %v1252_v8  }
 0x274   :  { %v1183_v61 = vpop.eup %1182  ;;  %950 = vmatpush.msrb.mxu2 %v1462_v22 }
 0x275   :  { %v1185_v63 = vpop.eup %1184  ;;  %v387_v2 = vmul.f32 %v1183_v61, %v385_v55 }
 0x276   :  { %v374_v16 = vmul.f32 %v1185_v63, %v372_v58  ;;  %951 = vmatpush.msrb.mxu2 %v1464_v23  ;;  %vm380_vm5 = vweird.f32 %v1185_v63  ;;  %v1207_v58 = vmov 96  }
 0x277   :  { %v1187_v21 = vpop.eup %1186  ;;  %v388_v24 = vmul.f32 %v1183_v61, %v387_v2  ;;  %vm381_vm8 = vmor %vm379_vm6, %vm380_vm5  ;;  %1158 = vset.pattern.permute.xlu0 %v1207_v58  ;;  %1159 = vset.pattern.permute.xlu2 %v1207_v58 }
 0x278   :  { %v375_v25 = vmul.f32 %v1185_v63, %v374_v16  ;;  %v402_v26 = vmul.f32 %v1187_v21, %v400_v59  ;;  %952 = vmatpush.msrb.mxu2 %v1470_v30  ;;  %vm408_vm7 = vweird.f32 %v1187_v21  ;;  %649 = vperm.xlu0 %1158, %v1308_v28  }
 0x279   :  { %v389_v32 = vmul.f32 0.5, %v388_v24  ;;  %vm409_vm12 = vmor %vm407_vm10, %vm408_vm7  ;;  %645 = vperm.xlu2 %1159, %v1252_v8   ;;  %v27_v8 = vld [vmem:[%s1713_s1 + $0x80] sm:$0x1] }
 0x27a   :  { %v376_v18 = vmul.f32 0.5, %v375_v25  ;;  %v403_v19 = vmul.f32 %v1187_v21, %v402_v26  ;;  %953 = vmatpush.msrb.mxu2 %v1468_v29 }
 0x27b   :  { %569 = vmatmul.f32.gmra.mxu2 %v234_v31  ;;  %v390_v35 = vsub.f32 1.5, %v389_v32  ;;  %657 = vperm.xlu1 %1160, %v1246_v6  }
 0x27c   :  { %v377_v36 = vsub.f32 1.5, %v376_v18  ;;  %v404_v37 = vmul.f32 0.5, %v403_v19  ;;  %954 = vmatpush.msrb.mxu2 %v1476_v27 }
 0x27d   :  { %v391_v40 = vmul.f32 %v1183_v61, %v390_v35 }
 0x27e   :  { %v405_v42 = vsub.f32 1.5, %v404_v37  ;;  %v378_v43 = vmul.f32 %v1185_v63, %v377_v36  ;;  %955 = vmatpush.msrb.mxu2 %v1478_v33  ;;  %v212_v37 = vpop.f32.mrf.mxu0 }
 0x27f   :  { %v392_v44 = vmul.f32 %v391_v40, %v385_v55 }
 0x280   :  { %v382_v45 = vsel %vm381_vm8, %v1185_v63, %v378_v43  ;;  %v406_v48 = vmul.f32 %v1187_v21, %v405_v42  ;;  %956 = vmatpush.msrb.mxu2 %v1484_v39  ;;  %637 = vperm.xlu0 %1158, %v1246_v6  }
 0x281   :  { %1087 = vpush %v382_v45  ;;  %v394_v50 = vsel %vm393_vm9, %v385_v55, %v392_v44  ;;  %641 = vperm.xlu2 %1159, %v1257_v9   ;;  %v1519_v55 = vld [vmem:[%s1713_s1 + $0x81] sm:$0x3] }
 0x282   :  { %v397_v51 = vsel %vm395_vm11, %v396_v46, %v394_v50  ;;  %v410_v52 = vsel %vm409_vm12, %v1187_v21, %v406_v48  ;;  %957 = vmatpush.msrb.mxu2 %v1482_v38  ;;  %v1522_v28 = vperm.slane %v1519_v55, 1 }
 0x283   :  { %1089 = vpush %v397_v51 }
 0x284   :  { %1091 = vpush %v410_v52 }
 0x286   :  { %v215_v43 = vpop.f32.mrf.mxu0 }
 0x287   :  { %v1564_v44 = vadd.f32 %v215_v43, %v1473_v10  ;;  %v1600_v43 = vpop.permute.xlu2 %476 }
 0x289   :  { %1161 = vset.pattern.permute.xlu2 %v1206_v56 }
 0x28a   :  { %661 = vperm.xlu2 %1161, %v1257_v9  }
 0x293   :  { %s1086_s10 = spop %1085 }
 0x2b2   :  { %s1088_s12 = spop %1087 }
 0x2b3   :  { %s384_s14 = smul.f32 %s1088_s12, %s1086_s10 }
 0x2b4   :  { %s1090_s15 = spop %1089 }
 0x2b5   :  { %v413_v59 = vstv %s384_s14  ;;  %s1092_s16 = spop %1091 }
 0x2b6   :  { %s412_s19 = smul.f32 %s1092_s16, %s1090_s15  ;;  %v417_v6 = vmul.f32 %v413_v59, %v1338_v53  ;;  %v416_v60 = vmul.f32 %v413_v59, %v1333_v47  ;;  %v415_v2 = vmul.f32 %v413_v59, %v1328_v41  ;;  %v414_v16 = vmul.f32 %v413_v59, %v1323_v34 }
 0x2b7   :  { %v1536_v47 = vperm.slane %v1519_v55, 0 }
 0x2b8   :  { %v418_v61 = vstv %s412_s19  ;;  %v495_v63 = vmul.f32 %v1522_v28, %v417_v6  ;;  %v494_v15 = vmul.f32 %v1522_v28, %v416_v60  ;;  %v493_v53 = vmul.f32 %v1522_v28, %v415_v2 }
 0x2b9   :  { %v419_v7 = vmul.f32 %v418_v61, %v27_v8  ;;  %v492_v41 = vmul.f32 %v1522_v28, %v414_v16  ;;  %v491_v26 = vmul.f32 %v1536_v47, %v417_v6  ;;  %v490_v34 = vmul.f32 %v1536_v47, %v416_v60 }
 0x2ba   :  { %748 = vmatpush.msrb.mxu3 %v495_v63  ;;  %v488_v18 = vmul.f32 %v1536_v47, %v414_v16 }
 0x2bb   :  { %v420_v21 = vperm.slane %v419_v7, 0 }
 0x2bc   :  { %749 = vmatpush.msrb.mxu3 %v494_v15 }
 0x2bd   :  { %v424_v24 = vmul.f32 %v420_v21, %v1356_v14  ;;  %v423_v25 = vmul.f32 %v420_v21, %v1351_v4  ;;  %v422_v32 = vmul.f32 %v420_v21, %v1346_v62  ;;  %v489_v14 = vmul.f32 %v1536_v47, %v415_v2 }
 0x2be   :  { %750 = vmatpush.msrb.mxu3 %v493_v53  ;;  %v421_v19 = vmul.f32 %v420_v21, %v1341_v57  ;;  %v1556_v57 = vadd.f32 %v212_v37, %v1449_v12  ;;  %v218_v12 = vpop.f32.mrf.mxu0  ;;  %v1210_v37 = vmov 1  }
 0x2bf   :  { %v434_v9 = vmul.f32 %v1522_v28, %v424_v24  ;;  %v433_v31 = vmul.f32 %v1522_v28, %v423_v25  ;;  %v432_v4 = vmul.f32 %v1522_v28, %v422_v32  ;;  %v429_v36 = vmul.f32 %v1536_v47, %v424_v24  ;;  %1163 = vset.pattern.permute.xlu2 %v1210_v37 }
 0x2c0   :  { %751 = vmatpush.msrb.mxu3 %v492_v41  ;;  %v431_v35 = vmul.f32 %v1522_v28, %v421_v19  ;;  %v428_v62 = vmul.f32 %v1536_v47, %v423_v25  ;;  %v427_v40 = vmul.f32 %v1536_v47, %v422_v32  ;;  %v426_v42 = vmul.f32 %v1536_v47, %v421_v19 }
 0x2c1   :  { %443 = vmatpush.xpose.msra.mxu1 %v434_v9 }
 0x2c2   :  { %752 = vmatpush.msrb.mxu3 %v491_v26 }
 0x2c4   :  { %753 = vmatpush.msrb.mxu3 %v490_v34 }
 0x2c5   :  { %444 = vmatpush.xpose.msra.mxu1 %v433_v31 }
 0x2c6   :  { %754 = vmatpush.msrb.mxu3 %v489_v14 }
 0x2c8   :  { %755 = vmatpush.msrb.mxu3 %v488_v18 }
 0x2c9   :  { %445 = vmatpush.xpose.msra.mxu1 %v432_v4 }
 0x2cd   :  { %446 = vmatpush.xpose.msra.mxu1 %v431_v35  ;;  %v1595_v35 = vpop.permute.xlu1 %472 }
 0x2d1   :  { %447 = vmatpush.xpose.msra.mxu1 %v429_v36  ;;  %v1209_v36 = vmov 0  }
 0x2d2   :  { %1164 = vset.pattern.permute.xlu1 %v1209_v36  ;;  %1162 = vset.pattern.permute.xlu0 %v1209_v36 }
 0x2d5   :  { %448 = vmatpush.xpose.msra.mxu1 %v428_v62 }
 0x2d9   :  { %449 = vmatpush.xpose.msra.mxu1 %v427_v40 }
 0x2dd   :  { %450 = vmatpush.xpose.msra.mxu1 %v426_v42 }
 0x2e0   :  { %451 = vmatmul.f32.vlgmr.msra.gmra.mxu1 %v1556_v57 }
 0x2e1   :  { %874 = vmatpush.msrb.mxu1 %v1439_v1 }
 0x2e3   :  { %875 = vmatpush.msrb.mxu1 %v1437_v0  ;;  %v1572_v0 = vadd.f32 %v218_v12, %v1488_v49  ;;  %v1602_v12 = vpop.permute.xlu1 %478 }
 0x2e5   :  { %876 = vmatpush.msrb.mxu1 %v1445_v5  ;;  %v1208_v5 = vmov 32.0  }
 0x2e6   :  { %v561_v45 = vpop.f32.mrf.mxu2  ;;  %1188 = vrcp.f32 %v1208_v5  ;;  %v646_v5 = vpop.permute.xlu2 %645 }
 0x2e7   :  { %877 = vmatpush.msrb.mxu1 %v1443_v3  ;;  %v221_v3 = vpop.f32.mrf.mxu0 }
 0x2e8   :  { %454 = vmatmul.f32.gmra.mxu1 %v1564_v44 }
 0x2e9   :  { %878 = vmatpush.msrb.mxu1 %v1447_v11  ;;  %v1580_v11 = vadd.f32 %v221_v3, %v1495_v54 }
 0x2eb   :  { %879 = vmatpush.msrb.mxu1 %v1452_v13 }
 0x2ed   :  { %880 = vmatpush.msrb.mxu1 %v1458_v20  ;;  %v573_v20 = vmul.f32 0.015625, %v561_v45 }
 0x2ee   :  { %v564_v1 = vpop.f32.mrf.mxu2 }
 0x2ef   :  { %881 = vmatpush.msrb.mxu1 %v1456_v17  ;;  %v574_v17 = vmul.f32 0.015625, %v564_v1 }
 0x2f0   :  { %457 = vmatmul.f32.gmra.mxu1 %v1572_v0 }
 0x2f1   :  { %882 = vmatpush.msrb.mxu1 %v1462_v22 }
 0x2f3   :  { %883 = vmatpush.msrb.mxu1 %v1464_v23  ;;  %v1189_v23 = vpop.eup %1188 }
 0x2f4   :  { %v592_v49 = vmul.f32 32.0, %v1189_v23  ;;  %vm596_vm14 = vweird.f32 %v1189_v23 }
 0x2f5   :  { %884 = vmatpush.msrb.mxu1 %v1470_v30  ;;  %v579_v30 = vsel %vm577_vm13, %v574_v17, 0.0 }
 0x2f6   :  { %v567_v13 = vpop.f32.mrf.mxu2 }
 0x2f7   :  { %885 = vmatpush.msrb.mxu1 %v1468_v29  ;;  %v575_v22 = vmul.f32 0.015625, %v567_v13  ;;  %v578_v29 = vsel %vm577_vm13, %v573_v20, 0.0  ;;  %v1604_v13 = vpop.permute.xlu0 %474 }
 0x2f8   :  { %460 = vmatmul.f32.gmra.mxu1 %v1580_v11 }
 0x2f9   :  { %886 = vmatpush.msrb.mxu1 %v1476_v27  ;;  %v581_v10 = vsel %vm577_vm13, %v575_v22, 0.0  ;;  %v580_v27 = vadd.f32 %v579_v30, %v578_v29 }
 0x2fb   :  { %887 = vmatpush.msrb.mxu1 %v1478_v33  ;;  %v582_v48 = vadd.f32 %v581_v10, %v580_v27  ;;  %v593_v33 = vsub.f32 1.0, %v592_v49  ;;  %v642_v27 = vpop.permute.xlu2 %641 }
 0x2fd   :  { %888 = vmatpush.msrb.mxu1 %v1484_v39  ;;  %v594_v56 = vmul.f32 %v1189_v23, %v593_v33 }
 0x2fe   :  { %v570_v54 = vpop.f32.mrf.mxu2 }
 0x2ff   :  { %889 = vmatpush.msrb.mxu1 %v1482_v38  ;;  %v576_v46 = vmul.f32 0.015625, %v570_v54  ;;  %v595_v39 = vadd.f32 %v1189_v23, %v594_v56  ;;  %v650_v54 = vpop.permute.xlu0 %649 }
 0x301   :  { %v583_v50 = vsel %vm577_vm13, %v576_v46, 0.0  ;;  %v597_v60 = vsel %vm596_vm14, %v1189_v23, %v595_v39 }
 0x302   :  { %v584_v51 = vadd.f32 %v583_v50, %v582_v48 }
 0x304   :  { %v585_v52 = vrot.slane %v584_v51, 4 }
 0x306   :  { %v586_v58 = vadd.f32 %v585_v52, %v584_v51 }
 0x308   :  { %v587_v59 = vrot.slane %v586_v58, 2 }
 0x30a   :  { %v588_v8 = vadd.f32 %v587_v59, %v586_v58  ;;  %v662_v58 = vpop.permute.xlu2 %661 }
 0x30c   :  { %v589_v6 = vrot.slane %v588_v8, 1 }
 0x30e   :  { %v590_v61 = vadd.f32 %v589_v6, %v588_v8  ;;  %v638_v8 = vpop.permute.xlu0 %637 }
 0x310   :  { %v598_v38 = vmul.f32 %v597_v60, %v590_v61 }
 0x312   :  { %v602_v63 = vsub.f32 %v576_v46, %v598_v38  ;;  %v599_v2 = vsub.f32 %v573_v20, %v598_v38  ;;  %v600_v7 = vsub.f32 %v574_v17, %v598_v38  ;;  %v601_v15 = vsub.f32 %v575_v22, %v598_v38  ;;  %v670_v22 = vpop.permute.xlu1 %669  ;;  %v1194_v38 = vld [vmem:[%s1713_s1 + $0x30] sm:$0xff] }
 0x314   :  { %v603_v16 = vmul.f32 %v599_v2, %v599_v2  ;;  %v604_v21 = vmul.f32 %v600_v7, %v600_v7  ;;  %v605_v53 = vmul.f32 %v601_v15, %v601_v15  ;;  %v606_v24 = vmul.f32 %v602_v63, %v602_v63 }
 0x316   :  { %v607_v41 = vsel %vm577_vm13, %v603_v16, 0.0  ;;  %v608_v9 = vsel %vm577_vm13, %v604_v21, 0.0  ;;  %v610_v26 = vsel %vm577_vm13, %v605_v53, 0.0  ;;  %v612_v31 = vsel %vm577_vm13, %v606_v24, 0.0  ;;  %v1196_v16 = vld [vmem:[%s1713_s1 + $0x28] sm:$0xff]  ;;  %v1197_v21 = vld [vmem:[%s1713_s1 + $0x20] sm:$0xff] }
 0x317   :  { %v609_v25 = vadd.f32 %v608_v9, %v607_v41  ;;  %v1212_v24 = vmov 98   ;;  %v1213_v41 = vmov 100  }
 0x319   :  { %v611_v34 = vadd.f32 %v610_v26, %v609_v25  ;;  %v1198_v26 = vld [vmem:[%s1713_s1 + $0x38] sm:$0xff] }
 0x31a   :  { %v666_v50 = vpop.permute.xlu1 %665 }
 0x31b   :  { %v613_v32 = vadd.f32 %v612_v31, %v611_v34  ;;  %v1199_v31 = vld [vmem:[%s1713_s1 + $0x10] sm:$0xff] }
 0x31d   :  { %v614_v14 = vrot.slane %v613_v32, 4 }
 0x31f   :  { %v615_v18 = vadd.f32 %v614_v14, %v613_v32 }
 0x321   :  { %v616_v4 = vrot.slane %v615_v18, 2 }
 0x323   :  { %v617_v19 = vadd.f32 %v616_v4, %v615_v18  ;;  %v1200_v18 = vld [vmem:[%s1713_s1 + $0x8] sm:$0xff] }
 0x325   :  { %v618_v62 = vrot.slane %v617_v19, 1 }
 0x327   :  { %v619_v40 = vadd.f32 %v618_v62, %v617_v19  ;;  %v1201_v19 = vld [vmem:[%s1713_s1 + $0x18] sm:$0xff] }
 0x329   :  { %v620_v42 = vmul.f32 %v619_v40, %v597_v60  ;;  %v658_v60 = vpop.permute.xlu1 %657 }
 0x32b   :  { %v621_v45 = vadd.f32 1e-05, %v620_v42 }
 0x32d   :  { %1190 = vrsqrt.f32 %v621_v45  ;;  %vm628_vm2 = vweird.f32 %v621_v45 }
 0x333   :  { %v1191_v1 = vpop.eup %1190 }
 0x334   :  { %v623_v3 = vmul.f32 %v1191_v1, %v621_v45  ;;  %vm629_vm15 = vweird.f32 %v1191_v1 }
 0x335   :  { %vm630_vm3 = vmor %vm628_vm2, %vm629_vm15 }
 0x336   :  { %v624_v17 = vmul.f32 %v1191_v1, %v623_v3 }
 0x338   :  { %v625_v20 = vmul.f32 0.5, %v624_v17 }
 0x33a   :  { %v626_v23 = vsub.f32 1.5, %v625_v20 }
 0x33c   :  { %v627_v30 = vmul.f32 %v1191_v1, %v626_v23 }
 0x33e   :  { %v631_v29 = vsel %vm630_vm3, %v1191_v1, %v627_v30 }
 0x33f   :  { %v634_v10 = vmul.f32 %v631_v29, %v601_v15  ;;  %v635_v49 = vmul.f32 %v631_v29, %v602_v63  ;;  %v633_v52 = vmul.f32 %v631_v29, %v600_v7  ;;  %v632_v39 = vmul.f32 %v631_v29, %v599_v2  ;;  %v1195_v15 = vld [vmem:[%s1713_s1] sm:$0xff] }
 0x340   :  { %v1211_v63 = vmov 99  }
 0x341   :  { %v654_v46 = vmul.f32 %v646_v5, %v634_v10  ;;  %v655_v48 = vmul.f32 %v650_v54, %v635_v49  ;;  %v653_v56 = vmul.f32 %v642_v27, %v633_v52  ;;  %v652_v6 = vmul.f32 %v638_v8, %v632_v39 }
 0x343   :  { %v675_v33 = vadd.f32 %v670_v22, %v655_v48  ;;  %v674_v51 = vadd.f32 %v666_v50, %v654_v46  ;;  %v673_v59 = vadd.f32 %v662_v58, %v653_v56  ;;  %v672_v61 = vadd.f32 %v658_v60, %v652_v6 }
 0x345   :  { %717 = vperm.xlu2 %1163, %v675_v33   ;;  %693 = vperm.xlu0 %1162, %v675_v33  }
 0x346   :  { %688 = vperm.xlu1 %1164, %v674_v51  }
 0x34d   :  { %1165 = vset.pattern.permute.xlu0 %v1210_v37  ;;  %713 = vperm.xlu2 %1163, %v674_v51  }
 0x34e   :  { %683 = vperm.xlu1 %1164, %v673_v59   ;;  %709 = vperm.xlu0 %1165, %v673_v59  }
 0x355   :  { %1166 = vset.pattern.permute.xlu2 %v1209_v36 }
 0x356   :  { %1167 = vset.pattern.permute.xlu1 %v1210_v37  ;;  %789 = vrot.lane.b32.xlu0 %v1194_v38, %s1205_s3 }
 0x357   :  { %705 = vperm.xlu1 %1167, %v672_v61   ;;  %678 = vperm.xlu2 %1166, %v672_v61  }
 0x358   :  { %1169 = vset.pattern.permute.xlu0 %v1211_v63 }
 0x35d   :  { %v452_v2 = vpop.f32.mrf.mxu1 }
 0x35e   :  { %v1061_v7 = vclamps-f32 %v452_v2, 32.0  ;;  %831 = vperm.xlu0 %1169, %v1195_v15  }
 0x35f   :  { %787 = vrot.lane.b32.xlu1 %v1196_v16, %s1205_s3  ;;  %785 = vrot.lane.b32.xlu2 %v1197_v21, %s1205_s3 }
 0x360   :  { %v484_v53 = vmul.f32 %v1061_v7, %v1595_v35  ;;  %1168 = vset.pattern.permute.xlu1 %v1212_v24  ;;  %1170 = vset.pattern.permute.xlu2 %v1213_v41 }
 0x362   :  { %1065 = vmatmul.msk.f32.vlgmr.msrb.gmra.mxu3 %vm53_vm0, %v484_v53 }
 0x365   :  { %v455_v9 = vpop.f32.mrf.mxu1 }
 0x366   :  { %v1062_v25 = vclamps-f32 %v455_v9, 32.0  ;;  %1173 = vset.pattern.permute.xlu0 %v1212_v24 }
 0x367   :  { %770 = vperm.xlu1 %1168, %v1195_v15   ;;  %791 = vrot.lane.b32.xlu2 %v1198_v26, %s1205_s3 }
 0x368   :  { %v485_v34 = vmul.f32 %v1062_v25, %v1604_v13  ;;  %778 = vperm.xlu0 %1173, %v1199_v31  }
 0x36a   :  { %1066 = vmatmul.msk.f32.gmra.mxu3 %vm53_vm0, %v485_v34 }
 0x36d   :  { %v458_v32 = vpop.f32.mrf.mxu1 }
 0x36e   :  { %v1063_v14 = vclamps-f32 %v458_v32, 32.0 }
 0x36f   :  { %774 = vperm.xlu1 %1168, %v1200_v18   ;;  %855 = vperm.xlu2 %1170, %v1195_v15  }
 0x370   :  { %v486_v4 = vmul.f32 %v1063_v14, %v1600_v43  ;;  %1176 = vset.pattern.permute.xlu0 %v1213_v41 }
 0x371   :  { %867 = vperm.xlu0 %1176, %v1201_v19  }
 0x372   :  { %1067 = vmatmul.msk.f32.gmra.mxu3 %vm53_vm0, %v486_v4 }
 0x375   :  { %v461_v35 = vpop.f32.mrf.mxu1 }
 0x376   :  { %v1064_v62 = vclamps-f32 %v461_v35, 32.0 }
 0x377   :  { %1172 = vset.pattern.permute.xlu1 %v1213_v41  ;;  %1171 = vset.pattern.permute.xlu2 %v1211_v63 }
 0x378   :  { %v487_v40 = vmul.f32 %v1064_v62, %v1602_v12  ;;  %859 = vperm.xlu1 %1172, %v1200_v18   ;;  %835 = vperm.xlu2 %1171, %v1200_v18  }
 0x379   :  { %1179 = vset.pattern.permute.xlu0 %v1210_v37 }
 0x37a   :  { %1068 = vmatmul.msk.f32.gmra.mxu3 %vm53_vm0, %v487_v40 }
 0x380   :  { %863 = vperm.xlu1 %1172, %v1199_v31   ;;  %839 = vperm.xlu2 %1171, %v1199_v31  }
 0x388   :  { %1175 = vset.pattern.permute.xlu1 %v1211_v63  ;;  %1174 = vset.pattern.permute.xlu2 %v1212_v24 }
 0x389   :  { %843 = vperm.xlu1 %1175, %v1201_v19   ;;  %782 = vperm.xlu2 %1174, %v1201_v19  }
 0x391   :  { %1178 = vset.pattern.permute.xlu1 %v1209_v36  ;;  %1177 = vset.pattern.permute.xlu2 %v1210_v37 }
 0x39f   :  { %v718_v45 = vpop.permute.xlu2 %717 }
 0x3a0   :  { %v723_v22 = vmul.f32 %v718_v45, %v1522_v28 }
 0x3a7   :  { %v714_v5 = vpop.permute.xlu2 %713 }
 0x3a8   :  { %v722_v36 = vmul.f32 %v714_v5, %v1522_v28 }
 0x3b1   :  { %v679_v29 = vpop.permute.xlu2 %678 }
 0x3b2   :  { %v696_v50 = vmul.f32 %v679_v29, %v1536_v47 }
 0x3b7   :  { %v694_v1 = vpop.permute.xlu0 %693 }
 0x3b8   :  { %v689_v43 = vpop.permute.xlu1 %688  ;;  %v699_v17 = vmul.f32 %v694_v1, %v1536_v47 }
 0x3b9   :  { %v698_v23 = vmul.f32 %v689_v43, %v1536_v47  ;;  %v786_v59 = vpop.permute.xlu2 %785 }
 0x3ba   :  { %v727_v49 = vadd.f32 %v723_v22, %v699_v17 }
 0x3bb   :  { %v726_v46 = vadd.f32 %v722_v36, %v698_v23 }
 0x3c0   :  { %v684_v3 = vpop.permute.xlu1 %683  ;;  %v710_v20 = vpop.permute.xlu0 %709 }
 0x3c1   :  { %v697_v37 = vmul.f32 %v684_v3, %v1536_v47  ;;  %v721_v10 = vmul.f32 %v710_v20, %v1522_v28  ;;  %v792_v8 = vpop.permute.xlu2 %791 }
 0x3c3   :  { %v725_v33 = vadd.f32 %v721_v10, %v697_v37 }
 0x3c9   :  { %v706_v30 = vpop.permute.xlu1 %705  ;;  %v856_v60 = vpop.permute.xlu2 %855 }
 0x3ca   :  { %v720_v54 = vmul.f32 %v706_v30, %v1522_v28  ;;  %v790_v28 = vpop.permute.xlu0 %789 }
 0x3cc   :  { %v724_v52 = vadd.f32 %v720_v54, %v696_v50 }
 0x3d1   :  { %v788_v39 = vpop.permute.xlu1 %787 }
 0x3d2   :  { %v832_v61 = vpop.permute.xlu0 %831  ;;  %v836_v16 = vpop.permute.xlu2 %835 }
 0x3d3   :  { %v846_v63 = vmul.f32 %v832_v61, %v1556_v57  ;;  %v847_v24 = vmul.f32 %v836_v16, %v1564_v44 }
 0x3d9   :  { %v771_v47 = vpop.permute.xlu1 %770 }
 0x3da   :  { %v840_v34 = vpop.permute.xlu2 %839  ;;  %v779_v31 = vpop.permute.xlu0 %778 }
 0x3db   :  { %v848_v14 = vmul.f32 %v840_v34, %v1572_v0 }
 0x3e1   :  { %v775_v6 = vpop.permute.xlu1 %774 }
 0x3e3   :  { %v783_v35 = vpop.permute.xlu2 %782 }
 0x3e5   :  { %v757_v42 = vpop.f32.mrf.mxu3 }
 0x3e6   :  { %v758_v58 = vadd.f32 %v757_v42, %v724_v52  ;;  %v868_v42 = vpop.permute.xlu0 %867 }
 0x3ea   :  { %v860_v7 = vpop.permute.xlu1 %859 }
 0x3ed   :  { %v760_v12 = vpop.f32.mrf.mxu3 }
 0x3ee   :  { %v761_v56 = vadd.f32 %v760_v12, %v725_v33 }
 0x3f2   :  { %v864_v25 = vpop.permute.xlu1 %863 }
 0x3f5   :  { %v763_v13 = vpop.f32.mrf.mxu3 }
 0x3f6   :  { %v764_v51 = vadd.f32 %v763_v13, %v726_v46 }
 0x3fb   :  { %v844_v19 = vpop.permute.xlu1 %843 }
 0x3fc   :  { %v849_v40 = vmul.f32 %v844_v19, %v1580_v11 }
 0x3fd   :  { %v766_v27 = vpop.f32.mrf.mxu3 }
 0x3fe   :  { %v767_v48 = vadd.f32 %v766_v27, %v727_v49 }
 0x400   :  { %813 = vmatpush.msra.mxu3 %v767_v48 }
 0x402   :  { %814 = vmatpush.msra.mxu3 %v764_v51 }
 0x404   :  { %815 = vmatpush.msra.mxu3 %v761_v56 }
 0x406   :  { %816 = vmatpush.msra.mxu3 %v758_v58 }
 0x407   :  { %1069 = vmatmul.msk.f32.vlgmr.msra.gmra.mxu3 %vm138_vm1, %v786_v59 }
 0x40f   :  { %1070 = vmatmul.msk.f32.gmra.mxu3 %vm138_vm1, %v788_v39 }
 0x417   :  { %1071 = vmatmul.msk.f32.gmra.mxu3 %vm138_vm1, %v790_v28 }
 0x41f   :  { %1072 = vmatmul.msk.f32.gmra.mxu3 %vm138_vm1, %v792_v8 }
 0x48a   :  { %v818_v38 = vpop.f32.mrf.mxu3 }
 0x48b   :  { %v819_v2 = vadd.f32 %v818_v38, %v771_v47 }
 0x48d   :  { %v850_v15 = vadd.f32 %v846_v63, %v819_v2 }
 0x48f   :  { %v870_v21 = vadd.f32 %v856_v60, %v850_v15 }
 0x491   :  { %890 = vmatmul.f32.vlgmr.msrb.gmra.mxu1 %v870_v21 }
 0x492   :  { %v821_v53 = vpop.f32.mrf.mxu3 }
 0x493   :  { %v822_v41 = vadd.f32 %v821_v53, %v775_v6 }
 0x495   :  { %v851_v9 = vadd.f32 %v847_v24, %v822_v41 }
 0x497   :  { %v871_v26 = vadd.f32 %v860_v7, %v851_v9 }
 0x499   :  { %893 = vmatmul.f32.gmra.mxu1 %v871_v26 }
 0x49a   :  { %v824_v32 = vpop.f32.mrf.mxu3 }
 0x49b   :  { %v825_v57 = vadd.f32 %v824_v32, %v779_v31 }
 0x49d   :  { %v852_v18 = vadd.f32 %v848_v14, %v825_v57 }
 0x49f   :  { %v872_v4 = vadd.f32 %v864_v25, %v852_v18 }
 0x4a1   :  { %896 = vmatmul.f32.gmra.mxu1 %v872_v4 }
 0x4a2   :  { %v827_v62 = vpop.f32.mrf.mxu3 }
 0x4a3   :  { %v828_v44 = vadd.f32 %v827_v62, %v783_v35 }
 0x4a5   :  { %v853_v43 = vadd.f32 %v849_v40, %v828_v44 }
 0x4a7   :  { %v873_v45 = vadd.f32 %v868_v42, %v853_v43 }
 0x4a9   :  { %899 = vmatmul.f32.gmra.mxu1 %v873_v45 }
 0x50e   :  { %v891_v12 = vpop.f32.mrf.mxu1 }
 0x50f   :  { %v903_v0 = vsel %vm577_vm13, %v891_v12, 0.0 }
 0x516   :  { %v894_v1 = vpop.f32.mrf.mxu1 }
 0x517   :  { %v904_v5 = vsel %vm577_vm13, %v894_v1, 0.0 }
 0x518   :  { %v905_v17 = vadd.f32 %v904_v5, %v903_v0 }
 0x51e   :  { %v897_v3 = vpop.f32.mrf.mxu1 }
 0x51f   :  { %v906_v13 = vsel %vm577_vm13, %v897_v3, 0.0 }
 0x520   :  { %v907_v20 = vadd.f32 %v906_v13, %v905_v17 }
 0x526   :  { %v900_v22 = vpop.f32.mrf.mxu1 }
 0x527   :  { %v908_v23 = vsel %vm577_vm13, %v900_v22, 0.0 }
 0x528   :  { %v909_v11 = vadd.f32 %v908_v23, %v907_v20 }
 0x52a   :  { %v910_v30 = vrot.slane %v909_v11, 4 }
 0x52c   :  { %v911_v36 = vadd.f32 %v910_v30, %v909_v11 }
 0x52e   :  { %v912_v29 = vrot.slane %v911_v36, 2 }
 0x530   :  { %v913_v37 = vadd.f32 %v912_v29, %v911_v36 }
 0x532   :  { %v914_v10 = vrot.slane %v913_v37, 1 }
 0x534   :  { %v915_v49 = vadd.f32 %v914_v10, %v913_v37 }
 0x536   :  { %v916_v27 = vmul.f32 0.00048828125, %v915_v49 }
 0x538   :  { %919 = vperm.xlu1 %1178, %v916_v27   ;;  %925 = vperm.xlu2 %1177, %v916_v27  }
 0x592   :  { %v926_v54 = vpop.permute.xlu2 %925 }
 0x593   :  { %v928_v46 = vmul.f32 %v926_v54, %v1519_v55 }
 0x595   :  { %v930_v50 = vrot.slane %v928_v46, 1 }
 0x5aa   :  { %v920_v48 = vpop.permute.xlu1 %919 }
 0x5ab   :  { %v922_v33 = vmul.f32 %v920_v48, %v1519_v55 }
 0x5ad   :  { %v932_v51 = vadd.f32 %v930_v50, %v922_v33 }
 0x5af   :  { %v933_v52 = vperm.slane %v932_v51, 0 }
 0x5b1   :  { %v934_v56 = vsub.f32 %v870_v21, %v933_v52  ;;  %v935_v59 = vsub.f32 %v871_v26, %v933_v52  ;;  %v936_v28 = vsub.f32 %v872_v4, %v933_v52  ;;  %v937_v47 = vsub.f32 %v873_v45, %v933_v52 }
 0x5b3   :  { %v938_v58 = vmul.f32 %v934_v56, %v934_v56  ;;  %v939_v39 = vmul.f32 %v935_v59, %v935_v59  ;;  %v940_v8 = vmul.f32 %v936_v28, %v936_v28  ;;  %v941_v6 = vmul.f32 %v937_v47, %v937_v47 }
 0x5b5   :  { %958 = vmatmul.f32.vlgmr.msrb.gmra.mxu2 %v938_v58 }
 0x5bd   :  { %961 = vmatmul.f32.gmra.mxu2 %v939_v39 }
 0x5c5   :  { %964 = vmatmul.f32.gmra.mxu2 %v940_v8 }
 0x5cd   :  { %967 = vmatmul.f32.gmra.mxu2 %v941_v6 }
 0x638   :  { %v959_v60 = vpop.f32.mrf.mxu2 }
 0x639   :  { %v971_v2 = vsel %vm577_vm13, %v959_v60, 0.0 }
 0x640   :  { %v962_v61 = vpop.f32.mrf.mxu2 }
 0x641   :  { %v972_v63 = vsel %vm577_vm13, %v962_v61, 0.0 }
 0x642   :  { %v973_v15 = vadd.f32 %v972_v63, %v971_v2 }
 0x648   :  { %v965_v38 = vpop.f32.mrf.mxu2 }
 0x649   :  { %v974_v7 = vsel %vm577_vm13, %v965_v38, 0.0 }
 0x64a   :  { %v975_v16 = vadd.f32 %v974_v7, %v973_v15 }
 0x650   :  { %v968_v21 = vpop.f32.mrf.mxu2 }
 0x651   :  { %v976_v53 = vsel %vm577_vm13, %v968_v21, 0.0 }
 0x652   :  { %v977_v24 = vadd.f32 %v976_v53, %v975_v16 }
 0x654   :  { %v978_v41 = vrot.slane %v977_v24, 4 }
 0x656   :  { %v979_v9 = vadd.f32 %v978_v41, %v977_v24 }
 0x658   :  { %v980_v25 = vrot.slane %v979_v9, 2 }
 0x65a   :  { %v981_v26 = vadd.f32 %v980_v25, %v979_v9 }
 0x65c   :  { %v982_v34 = vrot.slane %v981_v26, 1 }
 0x65e   :  { %v983_v31 = vadd.f32 %v982_v34, %v981_v26 }
 0x660   :  { %v984_v32 = vmul.f32 0.00048828125, %v983_v31 }
 0x662   :  { %v985_v14 = vadd.f32 1e-05, %v984_v32 }
 0x664   :  { %1192 = vrsqrt.f32 %v985_v14  ;;  %vm992_vm4 = vweird.f32 %v985_v14 }
 0x66a   :  { %v1193_v57 = vpop.eup %1192 }
 0x66b   :  { %v987_v18 = vmul.f32 %v1193_v57, %v985_v14  ;;  %vm993_vm1 = vweird.f32 %v1193_v57 }
 0x66c   :  { %vm994_vm5 = vmor %vm992_vm4, %vm993_vm1 }
 0x66d   :  { %v988_v4 = vmul.f32 %v1193_v57, %v987_v18 }
 0x66f   :  { %v989_v19 = vmul.f32 0.5, %v988_v4 }
 0x671   :  { %v990_v35 = vsub.f32 1.5, %v989_v19 }
 0x673   :  { %v991_v62 = vmul.f32 %v1193_v57, %v990_v35 }
 0x675   :  { %v995_v40 = vsel %vm994_vm5, %v1193_v57, %v991_v62 }
 0x676   :  { %998 = vperm.xlu1 %1178, %v995_v40   ;;  %1004 = vperm.xlu2 %1177, %v995_v40  }
 0x6d0   :  { %v1005_v44 = vpop.permute.xlu2 %1004 }
 0x6d1   :  { %v1007_v42 = vmul.f32 %v1005_v44, %v1519_v55 }
 0x6d3   :  { %v1009_v45 = vrot.slane %v1007_v42, 1 }
 0x6e8   :  { %v999_v43 = vpop.permute.xlu1 %998 }
 0x6e9   :  { %v1001_v12 = vmul.f32 %v999_v43, %v1519_v55 }
 0x6eb   :  { %v1011_v1 = vadd.f32 %v1009_v45, %v1001_v12 }
 0x6ed   :  { %v1012_v3 = vperm.slane %v1011_v1, 0 }
 0x6ef   :  { %v1015_v5 = vmul.f32 %v1012_v3, %v936_v28  ;;  %v1014_v0 = vmul.f32 %v1012_v3, %v935_v59  ;;  %v1013_v13 = vmul.f32 %v1012_v3, %v934_v56  ;;  %v1016_v17 = vmul.f32 %v1012_v3, %v937_v47 }
 0x6f1   :  { %1029 = vrot.lane.b32.xlu1 %v1015_v5, %s1202_s13  ;;  %1019 = vst.msk [vmem:[%s1714_s2 + $0x10] sm:$0xff] %vm53_vm0, %v1015_v5  ;;  %1027 = vrot.lane.b32.xlu2 %v1014_v0, %s1202_s13 }
 0x6f2   :  { %1018 = vst.msk [vmem:[%s1714_s2 + $0x8] sm:$0xff] %vm53_vm0, %v1014_v0  ;;  %1025 = vrot.lane.b32.xlu0 %v1013_v13, %s1202_s13 }
 0x6f3   :  { %1017 = vst.msk [vmem:[%s1714_s2] sm:$0xff] %vm53_vm0, %v1013_v13 }
 0x6f4   :  { %1020 = vst.msk [vmem:[%s1714_s2 + $0x18] sm:$0xff] %vm53_vm0, %v1016_v17 }
 0x6fa   :  { %1031 = vrot.lane.b32.xlu0 %v1016_v17, %s1202_s13 }
 0x74b   :  { %v1028_v55 = vpop.permute.xlu2 %1027 }
 0x74c   :  { %1038 = vst.msk [vmem:[%s1714_s2 + $0x28] sm:$0xff] %vm53_vm0, %v1028_v55 }
 0x763   :  { %v1030_v20 = vpop.permute.xlu1 %1029 }
 0x764   :  { %1039 = vst.msk [vmem:[%s1714_s2 + $0x30] sm:$0xff] %vm53_vm0, %v1030_v20  ;;  %v1026_v22 = vpop.permute.xlu0 %1025 }
 0x765   :  { %1037 = vst.msk [vmem:[%s1714_s2 + $0x20] sm:$0xff] %vm53_vm0, %v1026_v22 }
 0x76c   :  { %v1032_v23 = vpop.permute.xlu0 %1031 }
 0x76d   :  { %1040 = vst.msk [vmem:[%s1714_s2 + $0x38] sm:$0xff] %vm53_vm0, %v1032_v23 }

</bundles_post_ra>
